<compile_context>
chip_gen: v6e
topology: v6e:2x2x1
jax: 0.10.0
libtpu: 0.0.40
codegen_flags: <defaults>
</compile_context>

<pallas_src>
import jax
import jax.numpy as jnp
from jax.experimental import pallas as pl
from jax.experimental.pallas import tpu as pltpu

INPUT_SIZE = 784
HIDDEN_SIZE = 500
NUM_CLASSES = 10

HIDDEN_PAD = 512   # 500 -> 512: four clean 128-lane groups for both matmuls
OUT_PAD = 128      # 10  -> 128: lane-dense (unmasked) output stores


def _mlp_kernel(x_ref, w1t_ref, b1_ref, w2t_ref, b2_ref, o_ref):
    """Fused body: matmul -> bias -> ReLU -> matmul -> bias, all VMEM-resident."""
    mxu_dtype = w1t_ref.dtype                        # f32 or bf16 (set at prep)
    x = x_ref[...].astype(mxu_dtype)                 # (TB, 784)
    h = jnp.dot(x, w1t_ref[...],
                preferred_element_type=jnp.float32)  # (TB, 512) MXU, f32 acc
    h = jnp.maximum(h + b1_ref[...], 0.0)            # f32 epilogue on VPU
    o = jnp.dot(h.astype(mxu_dtype), w2t_ref[...],
                preferred_element_type=jnp.float32)  # (TB, 128) MXU, f32 acc
    o_ref[...] = (o + b2_ref[...]).astype(o_ref.dtype)


def prepare_params(w1, b1, w2, b2, *, mxu_dtype=jnp.float32):
    """One-time parameter preparation (do NOT call per forward pass).

    Transposes PyTorch (out, in) weights to (in, out), zero-pads hidden
    500 -> 512 and output 10 -> 128 (numerically identical: padded columns /
    rows are zero and padded outputs are sliced off), optionally casts weights
    to bf16 for the MXU. Biases stay f32 (epilogue runs in f32).
    """
    w1t = jnp.zeros((INPUT_SIZE, HIDDEN_PAD), jnp.float32)
    w1t = w1t.at[:, :HIDDEN_SIZE].set(jnp.transpose(w1))
    b1p = jnp.zeros((1, HIDDEN_PAD), jnp.float32).at[:, :HIDDEN_SIZE].set(b1)

    w2t = jnp.zeros((HIDDEN_PAD, OUT_PAD), jnp.float32)
    w2t = w2t.at[:HIDDEN_SIZE, :NUM_CLASSES].set(jnp.transpose(w2))
    b2p = jnp.zeros((1, OUT_PAD), jnp.float32).at[:, :NUM_CLASSES].set(b2)

    return (w1t.astype(mxu_dtype), b1p, w2t.astype(mxu_dtype), b2p)


def net_forward(x, params, *, block_batch=1024):
    """Pallas forward pass.

    x      : (B, 784) float32
    params : output of prepare_params(...)
    returns (B, 10) float32
    """
    w1t, b1p, w2t, b2p = params
    B = x.shape[0]
    # Batch tile: TB = 1024 keeps per-step VMEM use < ~10 MiB (safe on
    # v5e/v6e/v7x with double buffering) while amortizing the ~0.35 us
    # per-grid-step overhead. If B <= block_batch the tile is the full batch.
    tb = min(block_batch, B)
    nblk = pl.cdiv(B, tb)

    flops = 2 * B * (INPUT_SIZE * HIDDEN_PAD + HIDDEN_PAD * OUT_PAD)
    bytes_accessed = (
        x.size * x.dtype.itemsize
        + w1t.size * w1t.dtype.itemsize
        + w2t.size * w2t.dtype.itemsize
        + b1p.size * 4 + b2p.size * 4
        + B * OUT_PAD * 4
    )

    out_padded = pl.pallas_call(
        _mlp_kernel,
        out_shape=jax.ShapeDtypeStruct((B, OUT_PAD), jnp.float32),
        grid_spec=pltpu.PrefetchScalarGridSpec(
            num_scalar_prefetch=0,
            grid=(nblk,),
            in_specs=[
                # x: batch-tiled, pipelined across grid steps
                pl.BlockSpec((tb, INPUT_SIZE), lambda i: (i, 0)),
                # weights / biases: same block every step -> VMEM-resident
                pl.BlockSpec((INPUT_SIZE, HIDDEN_PAD), lambda i: (0, 0)),
                pl.BlockSpec((1, HIDDEN_PAD), lambda i: (0, 0)),
                pl.BlockSpec((HIDDEN_PAD, OUT_PAD), lambda i: (0, 0)),
                pl.BlockSpec((1, OUT_PAD), lambda i: (0, 0)),
            ],
            out_specs=pl.BlockSpec((tb, OUT_PAD), lambda i: (i, 0)),
        ),
        compiler_params=pltpu.CompilerParams(
            dimension_semantics=("parallel",),   # megacore sharding on v7x
        ),
        cost_estimate=pl.CostEstimate(
            flops=flops, transcendentals=0, bytes_accessed=bytes_accessed),
    )(x, w1t, b1p, w2t, b2p)

    return out_padded[:, :NUM_CLASSES]


def init_params(key):
    """Deterministic init mimicking PyTorch nn.Linear default U(-1/sqrt(fan_in), +1/sqrt(fan_in))."""
    k1, k2, k3, k4 = jax.random.split(key, 4)
    bound1 = 1.0 / (INPUT_SIZE ** 0.5)
    bound2 = 1.0 / (HIDDEN_SIZE ** 0.5)
    w1 = jax.random.uniform(k1, (HIDDEN_SIZE, INPUT_SIZE), jnp.float32,
                            minval=-bound1, maxval=bound1)
    b1 = jax.random.uniform(k2, (HIDDEN_SIZE,), jnp.float32,
                            minval=-bound1, maxval=bound1)
    w2 = jax.random.uniform(k3, (NUM_CLASSES, HIDDEN_SIZE), jnp.float32,
                            minval=-bound2, maxval=bound2)
    b2 = jax.random.uniform(k4, (NUM_CLASSES,), jnp.float32,
                            minval=-bound2, maxval=bound2)
    return w1, b1, w2, b2


if __name__ == "__main__":
    key = jax.random.PRNGKey(0)
    k_params, k_x = jax.random.split(key)

    w1, b1, w2, b2 = init_params(k_params)
    batch = 8
    x = jax.random.normal(k_x, (batch, INPUT_SIZE), jnp.float32)

    # Pure-JAX reference (matches the PyTorch forward).
    ref = jnp.maximum(x @ w1.T + b1, 0.0) @ w2.T + b2

    # f32 MXU path (exact agreement with reference).
    params_f32 = prepare_params(w1, b1, w2, b2, mxu_dtype=jnp.float32)
    out = jax.block_until_ready(net_forward(x, params_f32))
    assert out.shape == (batch, NUM_CLASSES), out.shape
    assert jnp.allclose(out, ref, atol=1e-4, rtol=1e-4), "f32 mismatch vs reference"

    # bf16 MXU-operand path (v6e/v7x fast path) — looser tolerance by design.
    params_bf16 = prepare_params(w1, b1, w2, b2, mxu_dtype=jnp.bfloat16)
    out_bf = jax.block_until_ready(net_forward(x, params_bf16))
    assert out_bf.shape == (batch, NUM_CLASSES), out_bf.shape
    assert jnp.allclose(out_bf, ref, atol=5e-2, rtol=5e-2), "bf16 mismatch vs reference"

    print("KERNEL_OK")
</pallas_src>

<mosaic_0001>
module attributes {stable_mosaic.version = 11 : i64} {
  func.func @_mlp_kernel(%arg0: i32, %arg1: memref<8x784xf32, #tpu.memory_space<vmem>>, %arg2: memref<784x512xf32, #tpu.memory_space<vmem>>, %arg3: memref<1x512xf32, #tpu.memory_space<vmem>>, %arg4: memref<512x128xf32, #tpu.memory_space<vmem>>, %arg5: memref<1x128xf32, #tpu.memory_space<vmem>>, %arg6: memref<8x128xf32, #tpu.memory_space<vmem>>) attributes {dimension_semantics = [#tpu.dimension_semantics<parallel>], iteration_bounds = array<i64: 1>, scalar_prefetch = 0 : i64, scratch_operands = 0 : i64, tpu.core_type = #tpu.core_type<tc>, window_params = [{transform_indices = @transform_0, window_bounds = array<i64: 8, 784>}, {pipeline_mode = #tpu.pipeline_mode<synchronous>, transform_indices = @transform_1, window_bounds = array<i64: 784, 512>}, {pipeline_mode = #tpu.pipeline_mode<synchronous>, transform_indices = @transform_2, window_bounds = array<i64: 1, 512>}, {pipeline_mode = #tpu.pipeline_mode<synchronous>, transform_indices = @transform_3, window_bounds = array<i64: 512, 128>}, {pipeline_mode = #tpu.pipeline_mode<synchronous>, transform_indices = @transform_4, window_bounds = array<i64: 1, 128>}, {transform_indices = @transform_5, window_bounds = array<i64: 8, 128>}]} {
    %c0 = arith.constant 0 : index
    %c0_0 = arith.constant 0 : index
    %0 = vector.load %arg1[%c0, %c0_0] : memref<8x784xf32, #tpu.memory_space<vmem>>, vector<8x784xf32>
    %c0_1 = arith.constant 0 : index
    %c0_2 = arith.constant 0 : index
    %1 = vector.load %arg2[%c0_1, %c0_2] : memref<784x512xf32, #tpu.memory_space<vmem>>, vector<784x512xf32>
    %cst = arith.constant dense<0.000000e+00> : vector<8x512xf32>
    %2 = tpu.matmul %0, %1, %cst {dimension_numbers = #tpu.dot_dimension_numbers<[1], [0], [0], [1], [0, 0, 1, 1], [], []>} : vector<8x784xf32>, vector<784x512xf32>, vector<8x512xf32> -> vector<8x512xf32>
    %c0_3 = arith.constant 0 : index
    %c0_4 = arith.constant 0 : index
    %3 = vector.load %arg3[%c0_3, %c0_4] : memref<1x512xf32, #tpu.memory_space<vmem>>, vector<1x512xf32>
    %4 = vector.broadcast %3 : vector<1x512xf32> to vector<8x512xf32>
    %5 = arith.addf %2, %4 : vector<8x512xf32>
    %cst_5 = arith.constant 0.000000e+00 : f32
    %6 = vector.broadcast %cst_5 : f32 to vector<8x512xf32>
    %7 = arith.maximumf %5, %6 : vector<8x512xf32>
    %c0_6 = arith.constant 0 : index
    %c0_7 = arith.constant 0 : index
    %8 = vector.load %arg4[%c0_6, %c0_7] : memref<512x128xf32, #tpu.memory_space<vmem>>, vector<512x128xf32>
    %cst_8 = arith.constant dense<0.000000e+00> : vector<8x128xf32>
    %9 = tpu.matmul %7, %8, %cst_8 {dimension_numbers = #tpu.dot_dimension_numbers<[1], [0], [0], [1], [0, 0, 1, 1], [], []>} : vector<8x512xf32>, vector<512x128xf32>, vector<8x128xf32> -> vector<8x128xf32>
    %c0_9 = arith.constant 0 : index
    %c0_10 = arith.constant 0 : index
    %10 = vector.load %arg5[%c0_9, %c0_10] : memref<1x128xf32, #tpu.memory_space<vmem>>, vector<1x128xf32>
    %11 = vector.broadcast %10 : vector<1x128xf32> to vector<8x128xf32>
    %12 = arith.addf %9, %11 : vector<8x128xf32>
    %c0_11 = arith.constant 0 : index
    %c0_12 = arith.constant 0 : index
    %13 = vector.load %arg6[%c0_11, %c0_12] : memref<8x128xf32, #tpu.memory_space<vmem>>, vector<8x128xf32>
    tpu.vector_store %arg6[%c0_11, %c0_12], %12 {strides = array<i32>} : memref<8x128xf32, #tpu.memory_space<vmem>>, vector<8x128xf32>,
    return
  }
  func.func @transform_0(%arg0: i32) -> (i32, i32) {
    %c0_i32 = arith.constant 0 : i32
    %c0_i32_0 = arith.constant 0 : i32
    return %arg0, %c0_i32 : i32, i32
  }
  func.func @transform_1(%arg0: i32) -> (i32, i32) {
    %c0_i32 = arith.constant 0 : i32
    %c0_i32_0 = arith.constant 0 : i32
    %c0_i32_1 = arith.constant 0 : i32
    return %c0_i32, %c0_i32_0 : i32, i32
  }
  func.func @transform_2(%arg0: i32) -> (i32, i32) {
    %c0_i32 = arith.constant 0 : i32
    %c0_i32_0 = arith.constant 0 : i32
    %c0_i32_1 = arith.constant 0 : i32
    return %c0_i32, %c0_i32_0 : i32, i32
  }
  func.func @transform_3(%arg0: i32) -> (i32, i32) {
    %c0_i32 = arith.constant 0 : i32
    %c0_i32_0 = arith.constant 0 : i32
    %c0_i32_1 = arith.constant 0 : i32
    return %c0_i32, %c0_i32_0 : i32, i32
  }
  func.func @transform_4(%arg0: i32) -> (i32, i32) {
    %c0_i32 = arith.constant 0 : i32
    %c0_i32_0 = arith.constant 0 : i32
    %c0_i32_1 = arith.constant 0 : i32
    return %c0_i32, %c0_i32_0 : i32, i32
  }
  func.func @transform_5(%arg0: i32) -> (i32, i32) {
    %c0_i32 = arith.constant 0 : i32
    %c0_i32_0 = arith.constant 0 : i32
    return %arg0, %c0_i32 : i32, i32
  }
}

</mosaic_0001>

<bundles_post_ra>
// kernel: tpu_custom_call.1
= control target key start
LH: loop header
LB: loop body
LE: loop exit
PB: predicated region body
PF: predicated region fallthrough
CT: control target
= control target key end

     0   :  { %10 = vsyncpa [#allocation3], 0  ;;  %s1603_s0 = inlined_call_operand.hbm [shape: f32[8,784], index: 0, kind: input, shape index: {}]   ;;  %s1604_s1 = inlined_call_operand.hbm [shape: f32[784,512], index: 1, kind: input, shape index: {}]   ;;  %s1605_s2 = inlined_call_operand.hbm [shape: f32[1,512], index: 2, kind: input, shape index: {}]   ;;  %s1606_s3 = inlined_call_operand.hbm [shape: f32[512,128], index: 3, kind: input, shape index: {}]   ;;  %s1607_s4 = inlined_call_operand.hbm [shape: f32[1,128], index: 4, kind: input, shape index: {}]   ;;  %s1608_s5 = inlined_call_operand.hbm [shape: f32[8,128], index: 5, kind: output, shape index: {}]  }
   0x1   :  { %11 = vsyncpa [#allocation6], 0 }
   0x2   :  { %12 = vsyncpa [#allocation9], 0 }
   0x3   :  { %13 = vsyncpa [#allocation4], 0  ;;  %s1524_s18 = smov [#allocation5]  }
   0x4   :  { %s29_s19 = sshll.u32 %s1524_s18, 4  ;;  %s30_s19 = int_to_ptr.vmem [resolvable:$true] %s29_s19 }
   0x5   :  { %s1404_s20 = scalar_lea.vmem %s30_s19, 50176  ;;  %p1409_p1 = scmp.lt.s32.totalorder %s30_s19, %s30_s19 }
   0x6   :  { %p1405_p0 = scmp.ne.s32.totalorder %s30_s19, %s1404_s20  ;;  %p1410_p2 = scmp.lt.s32.totalorder %s1404_s20, %s1404_s20 }
   0x8   :  { %p1411_p3 = por %p1410_p2, %p1409_p1 }
   0xa   :  { %p1412_p4 = pnand %p1411_p3, %p1405_p0 }
   0xc   :  { %1415 = shalt.err (!%p1412_p4)
}
   0xd   :  { %s1525_s21 = smov 512   ;;  %s1526_s22 = smov 32  }
   0xe   :  { %35 = dma.hbm_to_vmem [thread:$0]  %s1604_s1, 50176, %s30_s19, [#allocation6], %s1525_s21, %s1525_s21, %s1526_s22  }
   0xf   :  { %s1527_s25 = smov [#allocation8]  }
  0x10   :  { %s51_s26 = sshll.u32 %s1527_s25, 4  ;;  %s52_s26 = int_to_ptr.vmem [resolvable:$true] %s51_s26 }
  0x11   :  { %s1424_s27 = scalar_lea.vmem %s52_s26, 8192  ;;  %p1429_p6 = scmp.lt.s32.totalorder %s52_s26, %s52_s26 }
  0x12   :  { %p1425_p5 = scmp.ne.s32.totalorder %s52_s26, %s1424_s27  ;;  %p1430_p7 = scmp.lt.s32.totalorder %s1424_s27, %s1424_s27 }
  0x14   :  { %p1431_p8 = por %p1430_p7, %p1429_p6 }
  0x16   :  { %p1432_p9 = pnand %p1431_p8, %p1425_p5 }
  0x18   :  { %1435 = shalt.err (!%p1432_p9)
}
  0x19   :  { %s1528_s28 = smov 128   ;;  %s1529_s29 = smov 8  }
  0x1a   :  { %57 = dma.hbm_to_vmem [thread:$0]  %s1606_s3, 8192, %s52_s26, [#allocation9], %s1528_s28, %s1528_s28, %s1529_s29  }
  0x1b   :  { %s1530_s7 = smov [#allocation2]   ;;  %s1531_s9 = smov [#allocation7]  }
  0x1c   :  { %s20_s8 = sshll.u32 %s1530_s7, 4  ;;  %s42_s1 = sshll.u32 %s1531_s9, 4  ;;  %s21_s8 = int_to_ptr.vmem [resolvable:$true] %s20_s8  ;;  %s43_s1 = int_to_ptr.vmem [resolvable:$true] %s42_s1 }
  0x1d   :  { %s1444_s10 = scalar_lea.vmem %s21_s8, 896  ;;  %p1449_p11 = scmp.lt.s32.totalorder %s21_s8, %s21_s8 }
  0x1e   :  { %p1445_p10 = scmp.ne.s32.totalorder %s21_s8, %s1444_s10  ;;  %p1450_p12 = scmp.lt.s32.totalorder %s1444_s10, %s1444_s10 }
  0x20   :  { %p1451_p13 = por %p1450_p12, %p1449_p11 }
  0x22   :  { %p1452_p0 = pnand %p1451_p13, %p1445_p10 }
  0x24   :  { %1455 = shalt.err (!%p1452_p0)
}
  0x25   :  { %23 = dma.hbm_to_vmem [thread:$0]  %s1603_s0, 896, %s21_s8, [#allocation3]  }
  0x26   :  { %s1464_s13 = scalar_lea.vmem %s43_s1, 64  ;;  %p1469_p2 = scmp.lt.s32.totalorder %s43_s1, %s43_s1 }
  0x27   :  { %p1465_p1 = scmp.ne.s32.totalorder %s43_s1, %s1464_s13  ;;  %p1470_p3 = scmp.lt.s32.totalorder %s1464_s13, %s1464_s13 }
  0x29   :  { %p1471_p4 = por %p1470_p3, %p1469_p2 }
  0x2b   :  { %p1472_p5 = pnand %p1471_p4, %p1465_p1 }
  0x2d   :  { %1475 = shalt.err (!%p1472_p5)
}
  0x2e   :  { %45 = dma.hbm_to_vmem [thread:$0]  %s1605_s2, 64, %s43_s1, [#allocation6]  }
  0x2f   :  { %s1532_s15 = smov [#allocation10]  }
  0x30   :  { %s64_s16 = sshll.u32 %s1532_s15, 4  ;;  %s65_s16 = int_to_ptr.vmem [resolvable:$true] %s64_s16 }
  0x31   :  { %s1484_s17 = scalar_lea.vmem %s65_s16, 16  ;;  %s1488_s18 = scalar_lea.vmem %s65_s16, 32 }
  0x32   :  { %p1485_p6 = scmp.ne.s32.totalorder %s65_s16, %s1484_s17  ;;  %p1489_p7 = scmp.lt.s32.totalorder %s65_s16, %s65_s16 }
  0x33   :  { %p1490_p8 = scmp.lt.s32.totalorder %s1488_s18, %s1484_s17 }
  0x35   :  { %p1491_p9 = por %p1490_p8, %p1489_p7 }
  0x37   :  { %p1492_p10 = pnand %p1491_p9, %p1485_p6 }
  0x39   :  { %1495 = shalt.err (!%p1492_p10)
}
  0x3a   :  { %67 = dma.hbm_to_vmem [thread:$0]  %s1607_s4, 16, %s65_s16, [#allocation9]  }
  0x3b   :  { %1516 = dma.done.wait [#allocation3], 896  }
  0x3c   :  { %1517 = vsyncadd [#allocation3], 4294966400 }
  0x3d   :  { %1518 = dma.done.wait [#allocation6], 50240  }
  0x3e   :  { %1519 = vsyncadd [#allocation6], 4294917056 }
  0x3f   :  { %1520 = dma.done.wait [#allocation9], 8208  }
  0x40   :  { %1521 = vsyncadd [#allocation9], 4294959088  ;;  %v151_v0 = vld [vmem:[#allocation5 + $0x1e8] sm:$0xff]  ;;  %v150_v2 = vld [vmem:[#allocation5 + $0x1e0] sm:$0xff]  ;;  %vm504_vm0 = vcmask 130048   ;;  %s1534_s2 = smov [#allocation11]  }
  0x41   :  { %v279_v1 = vld [vmem:[#allocation5 + $0x5e8] sm:$0xff]  ;;  %508 = vmatprep.subr.mxu0 %v151_v0  ;;  %v278_v3 = vld [vmem:[#allocation5 + $0x5e0] sm:$0xff]  ;;  %s1298_s4 = sshll.u32 %s1534_s2, 4  ;;  %s1299_s4 = int_to_ptr.vmem [resolvable:$true] %s1298_s4 }
  0x42   :  { %579 = vmatprep.subr.mxu1 %v279_v1  ;;  %v147_v4 = vld [vmem:[#allocation5 + $0x1c8] sm:$0xff]  ;;  %509 = vmatpush1.msra.mxu0 %v150_v2  ;;  %v146_v6 = vld [vmem:[#allocation5 + $0x1c0] sm:$0xff]  ;;  %s1496_s20 = scalar_lea.vmem %s1299_s4, 128  ;;  %p1501_p12 = scmp.lt.s32.totalorder %s1299_s4, %s1299_s4 }
  0x43   :  { %v275_v5 = vld [vmem:[#allocation5 + $0x5c8] sm:$0xff]  ;;  %580 = vmatpush1.msra.mxu1 %v278_v3  ;;  %v274_v7 = vld [vmem:[#allocation5 + $0x5c0] sm:$0xff]  ;;  %510 = vmatprep.subr.mxu0 %v147_v4  ;;  %p1497_p11 = scmp.ne.s32.totalorder %s1299_s4, %s1496_s20  ;;  %p1502_p13 = scmp.lt.s32.totalorder %s1496_s20, %s1496_s20 }
  0x44   :  { %v143_v8 = vld [vmem:[#allocation5 + $0x1a8] sm:$0xff]  ;;  %581 = vmatprep.subr.mxu1 %v275_v5  ;;  %v142_v10 = vld [vmem:[#allocation5 + $0x1a0] sm:$0xff]  ;;  %511 = vmatpush1.msra.mxu0 %v146_v6 }
  0x45   :  { %v271_v9 = vld [vmem:[#allocation5 + $0x5a8] sm:$0xff]  ;;  %v270_v11 = vld [vmem:[#allocation5 + $0x5a0] sm:$0xff]  ;;  %582 = vmatpush1.msra.mxu1 %v274_v7  ;;  %512 = vmatprep.subr.mxu0 %v143_v8  ;;  %p1503_p0 = por %p1502_p13, %p1501_p12 }
  0x46   :  { %v139_v12 = vld [vmem:[#allocation5 + $0x188] sm:$0xff]  ;;  %583 = vmatprep.subr.mxu1 %v271_v9  ;;  %v138_v14 = vld [vmem:[#allocation5 + $0x180] sm:$0xff]  ;;  %513 = vmatpush1.msra.mxu0 %v142_v10 }
  0x47   :  { %v267_v13 = vld [vmem:[#allocation5 + $0x588] sm:$0xff]  ;;  %v266_v15 = vld [vmem:[#allocation5 + $0x580] sm:$0xff]  ;;  %584 = vmatpush1.msra.mxu1 %v270_v11  ;;  %514 = vmatprep.subr.mxu0 %v139_v12  ;;  %p1504_p1 = pnand %p1503_p0, %p1497_p11 }
  0x48   :  { %v135_v16 = vld [vmem:[#allocation5 + $0x168] sm:$0xff]  ;;  %585 = vmatprep.subr.mxu1 %v267_v13  ;;  %v134_v18 = vld [vmem:[#allocation5 + $0x160] sm:$0xff]  ;;  %515 = vmatpush1.msra.mxu0 %v138_v14 }
  0x49   :  { %v263_v17 = vld [vmem:[#allocation5 + $0x568] sm:$0xff]  ;;  %v262_v19 = vld [vmem:[#allocation5 + $0x560] sm:$0xff]  ;;  %586 = vmatpush1.msra.mxu1 %v266_v15  ;;  %516 = vmatprep.subr.mxu0 %v135_v16 }
  0x4a   :  { %v131_v20 = vld [vmem:[#allocation5 + $0x148] sm:$0xff]  ;;  %587 = vmatprep.subr.mxu1 %v263_v17  ;;  %v130_v22 = vld [vmem:[#allocation5 + $0x140] sm:$0xff]  ;;  %517 = vmatpush1.msra.mxu0 %v134_v18 }
  0x4b   :  { %v259_v21 = vld [vmem:[#allocation5 + $0x548] sm:$0xff]  ;;  %v258_v23 = vld [vmem:[#allocation5 + $0x540] sm:$0xff]  ;;  %588 = vmatpush1.msra.mxu1 %v262_v19  ;;  %518 = vmatprep.subr.mxu0 %v131_v20 }
  0x4c   :  { %v127_v24 = vld [vmem:[#allocation5 + $0x128] sm:$0xff]  ;;  %589 = vmatprep.subr.mxu1 %v259_v21  ;;  %v126_v26 = vld [vmem:[#allocation5 + $0x120] sm:$0xff]  ;;  %519 = vmatpush1.msra.mxu0 %v130_v22 }
  0x4d   :  { %v255_v25 = vld [vmem:[#allocation5 + $0x528] sm:$0xff]  ;;  %v254_v27 = vld [vmem:[#allocation5 + $0x520] sm:$0xff]  ;;  %590 = vmatpush1.msra.mxu1 %v258_v23  ;;  %520 = vmatprep.subr.mxu0 %v127_v24 }
  0x4e   :  { %v123_v28 = vld [vmem:[#allocation5 + $0x108] sm:$0xff]  ;;  %591 = vmatprep.subr.mxu1 %v255_v25  ;;  %v122_v30 = vld [vmem:[#allocation5 + $0x100] sm:$0xff]  ;;  %521 = vmatpush1.msra.mxu0 %v126_v26 }
  0x4f   :  { %v251_v29 = vld [vmem:[#allocation5 + $0x508] sm:$0xff]  ;;  %v250_v31 = vld [vmem:[#allocation5 + $0x500] sm:$0xff]  ;;  %592 = vmatpush1.msra.mxu1 %v254_v27  ;;  %522 = vmatprep.subr.mxu0 %v123_v28 }
  0x50   :  { %v119_v32 = vld [vmem:[#allocation5 + $0xe8] sm:$0xff]  ;;  %593 = vmatprep.subr.mxu1 %v251_v29  ;;  %v118_v34 = vld [vmem:[#allocation5 + $0xe0] sm:$0xff]  ;;  %523 = vmatpush1.msra.mxu0 %v122_v30 }
  0x51   :  { %v247_v33 = vld [vmem:[#allocation5 + $0x4e8] sm:$0xff]  ;;  %v246_v35 = vld [vmem:[#allocation5 + $0x4e0] sm:$0xff]  ;;  %594 = vmatpush1.msra.mxu1 %v250_v31  ;;  %524 = vmatprep.subr.mxu0 %v119_v32 }
  0x52   :  { %v115_v36 = vld [vmem:[#allocation5 + $0xc8] sm:$0xff]  ;;  %595 = vmatprep.subr.mxu1 %v247_v33  ;;  %v114_v38 = vld [vmem:[#allocation5 + $0xc0] sm:$0xff]  ;;  %525 = vmatpush1.msra.mxu0 %v118_v34 }
  0x53   :  { %v243_v37 = vld [vmem:[#allocation5 + $0x4c8] sm:$0xff]  ;;  %v242_v39 = vld [vmem:[#allocation5 + $0x4c0] sm:$0xff]  ;;  %596 = vmatpush1.msra.mxu1 %v246_v35  ;;  %526 = vmatprep.subr.mxu0 %v115_v36 }
  0x54   :  { %v111_v40 = vld [vmem:[#allocation5 + $0xa8] sm:$0xff]  ;;  %597 = vmatprep.subr.mxu1 %v243_v37  ;;  %v110_v42 = vld [vmem:[#allocation5 + $0xa0] sm:$0xff]  ;;  %527 = vmatpush1.msra.mxu0 %v114_v38 }
  0x55   :  { %v239_v41 = vld [vmem:[#allocation5 + $0x4a8] sm:$0xff]  ;;  %v238_v43 = vld [vmem:[#allocation5 + $0x4a0] sm:$0xff]  ;;  %598 = vmatpush1.msra.mxu1 %v242_v39  ;;  %528 = vmatprep.subr.mxu0 %v111_v40 }
  0x56   :  { %v107_v44 = vld [vmem:[#allocation5 + $0x88] sm:$0xff]  ;;  %599 = vmatprep.subr.mxu1 %v239_v41  ;;  %v106_v46 = vld [vmem:[#allocation5 + $0x80] sm:$0xff]  ;;  %529 = vmatpush1.msra.mxu0 %v110_v42 }
  0x57   :  { %v235_v45 = vld [vmem:[#allocation5 + $0x488] sm:$0xff]  ;;  %v234_v47 = vld [vmem:[#allocation5 + $0x480] sm:$0xff]  ;;  %600 = vmatpush1.msra.mxu1 %v238_v43  ;;  %530 = vmatprep.subr.mxu0 %v107_v44 }
  0x58   :  { %v103_v48 = vld [vmem:[#allocation5 + $0x68] sm:$0xff]  ;;  %601 = vmatprep.subr.mxu1 %v235_v45  ;;  %v102_v50 = vld [vmem:[#allocation5 + $0x60] sm:$0xff]  ;;  %531 = vmatpush1.msra.mxu0 %v106_v46 }
  0x59   :  { %v231_v49 = vld [vmem:[#allocation5 + $0x468] sm:$0xff]  ;;  %v230_v51 = vld [vmem:[#allocation5 + $0x460] sm:$0xff]  ;;  %602 = vmatpush1.msra.mxu1 %v234_v47  ;;  %532 = vmatprep.subr.mxu0 %v103_v48 }
  0x5a   :  { %v99_v52 = vld [vmem:[#allocation5 + $0x48] sm:$0xff]  ;;  %603 = vmatprep.subr.mxu1 %v231_v49  ;;  %v98_v54 = vld [vmem:[#allocation5 + $0x40] sm:$0xff]  ;;  %533 = vmatpush1.msra.mxu0 %v102_v50 }
  0x5b   :  { %v227_v53 = vld [vmem:[#allocation5 + $0x448] sm:$0xff]  ;;  %v226_v55 = vld [vmem:[#allocation5 + $0x440] sm:$0xff]  ;;  %604 = vmatpush1.msra.mxu1 %v230_v51  ;;  %534 = vmatprep.subr.mxu0 %v99_v52 }
  0x5c   :  { %v95_v56 = vld [vmem:[#allocation5 + $0x28] sm:$0xff]  ;;  %605 = vmatprep.subr.mxu1 %v227_v53  ;;  %v94_v58 = vld [vmem:[#allocation5 + $0x20] sm:$0xff]  ;;  %535 = vmatpush1.msra.mxu0 %v98_v54 }
  0x5d   :  { %v223_v57 = vld [vmem:[#allocation5 + $0x428] sm:$0xff]  ;;  %v222_v59 = vld [vmem:[#allocation5 + $0x420] sm:$0xff]  ;;  %606 = vmatpush1.msra.mxu1 %v226_v55  ;;  %536 = vmatprep.subr.mxu0 %v95_v56 }
  0x5e   :  { %v91_v60 = vld [vmem:[#allocation5 + $0x8] sm:$0xff]  ;;  %607 = vmatprep.subr.mxu1 %v223_v57  ;;  %v90_v62 = vld [vmem:[#allocation5] sm:$0xff]  ;;  %537 = vmatpush1.msra.mxu0 %v94_v58 }
  0x5f   :  { %v219_v61 = vld [vmem:[#allocation5 + $0x408] sm:$0xff]  ;;  %v218_v63 = vld [vmem:[#allocation5 + $0x400] sm:$0xff]  ;;  %608 = vmatpush1.msra.mxu1 %v222_v59  ;;  %538 = vmatprep.subr.mxu0 %v91_v60 }
  0x60   :  { %v215_v0 = vld [vmem:[#allocation5 + $0x3e8] sm:$0xff]  ;;  %609 = vmatprep.subr.mxu1 %v219_v61  ;;  %v214_v2 = vld [vmem:[#allocation5 + $0x3e0] sm:$0xff]  ;;  %539 = vmatpush1.msra.mxu0 %v90_v62 }
  0x61   :  { %v343_v1 = vld [vmem:[#allocation5 + $0x7e8] sm:$0xff]  ;;  %v342_v3 = vld [vmem:[#allocation5 + $0x7e0] sm:$0xff]  ;;  %610 = vmatpush1.msra.mxu1 %v218_v63  ;;  %540 = vmatprep.subr.mxu0 %v215_v0  ;;  %v1580_v63 = vld [vmem:[#allocation2 + $0x8] sm:$0xff] }
  0x62   :  { %v211_v4 = vld [vmem:[#allocation5 + $0x3c8] sm:$0xff]  ;;  %611 = vmatprep.subr.mxu1 %v343_v1  ;;  %v210_v6 = vld [vmem:[#allocation5 + $0x3c0] sm:$0xff]  ;;  %541 = vmatpush2.msra.mxu0 %v214_v2 }
  0x63   :  { %v339_v5 = vld [vmem:[#allocation5 + $0x7c8] sm:$0xff]  ;;  %v338_v7 = vld [vmem:[#allocation5 + $0x7c0] sm:$0xff]  ;;  %612 = vmatpush2.msra.mxu1 %v342_v3  ;;  %542 = vmatprep.subr.mxu0 %v211_v4  ;;  %v85_v3 = vld [vmem:[#allocation2 + $0x10] sm:$0xff] }
  0x64   :  { %v207_v8 = vld [vmem:[#allocation5 + $0x3a8] sm:$0xff]  ;;  %613 = vmatprep.subr.mxu1 %v339_v5  ;;  %v206_v10 = vld [vmem:[#allocation5 + $0x3a0] sm:$0xff]  ;;  %543 = vmatpush2.msra.mxu0 %v210_v6 }
  0x65   :  { %v335_v9 = vld [vmem:[#allocation5 + $0x7a8] sm:$0xff]  ;;  %v334_v11 = vld [vmem:[#allocation5 + $0x7a0] sm:$0xff]  ;;  %614 = vmatpush2.msra.mxu1 %v338_v7  ;;  %544 = vmatprep.subr.mxu0 %v207_v8 }
  0x66   :  { %v203_v12 = vld [vmem:[#allocation5 + $0x388] sm:$0xff]  ;;  %615 = vmatprep.subr.mxu1 %v335_v9  ;;  %v202_v14 = vld [vmem:[#allocation5 + $0x380] sm:$0xff]  ;;  %545 = vmatpush2.msra.mxu0 %v206_v10 }
  0x67   :  { %v331_v13 = vld [vmem:[#allocation5 + $0x788] sm:$0xff]  ;;  %v330_v15 = vld [vmem:[#allocation5 + $0x780] sm:$0xff]  ;;  %616 = vmatpush2.msra.mxu1 %v334_v11  ;;  %546 = vmatprep.subr.mxu0 %v203_v12 }
  0x68   :  { %v199_v16 = vld [vmem:[#allocation5 + $0x368] sm:$0xff]  ;;  %617 = vmatprep.subr.mxu1 %v331_v13  ;;  %v198_v18 = vld [vmem:[#allocation5 + $0x360] sm:$0xff]  ;;  %547 = vmatpush2.msra.mxu0 %v202_v14  ;;  %v89_v13 = vld [vmem:[#allocation2 + $0x30] sm:$0xff] }
  0x69   :  { %v327_v17 = vld [vmem:[#allocation5 + $0x768] sm:$0xff]  ;;  %v326_v19 = vld [vmem:[#allocation5 + $0x760] sm:$0xff]  ;;  %618 = vmatpush2.msra.mxu1 %v330_v15  ;;  %548 = vmatprep.subr.mxu0 %v199_v16  ;;  %v153_v14 = vld [vmem:[#allocation5 + $0x1f8] sm:$0xff] }
  0x6a   :  { %v195_v20 = vld [vmem:[#allocation5 + $0x348] sm:$0xff]  ;;  %619 = vmatprep.subr.mxu1 %v327_v17  ;;  %v194_v22 = vld [vmem:[#allocation5 + $0x340] sm:$0xff]  ;;  %549 = vmatpush2.msra.mxu0 %v198_v18  ;;  %v152_v16 = vld [vmem:[#allocation5 + $0x1f0] sm:$0xff]  ;;  %v1533_v17 = vmov 0.0  }
  0x6b   :  { %v323_v21 = vld [vmem:[#allocation5 + $0x748] sm:$0xff]  ;;  %v322_v23 = vld [vmem:[#allocation5 + $0x740] sm:$0xff]  ;;  %620 = vmatpush2.msra.mxu1 %v326_v19  ;;  %550 = vmatprep.subr.mxu0 %v195_v20  ;;  %v149_v19 = vld [vmem:[#allocation5 + $0x1d8] sm:$0xff] }
  0x6c   :  { %v191_v24 = vld [vmem:[#allocation5 + $0x328] sm:$0xff]  ;;  %621 = vmatprep.subr.mxu1 %v323_v21  ;;  %v190_v26 = vld [vmem:[#allocation5 + $0x320] sm:$0xff]  ;;  %551 = vmatpush2.msra.mxu0 %v194_v22  ;;  %v148_v21 = vld [vmem:[#allocation5 + $0x1d0] sm:$0xff] }
  0x6d   :  { %v319_v25 = vld [vmem:[#allocation5 + $0x728] sm:$0xff]  ;;  %v318_v27 = vld [vmem:[#allocation5 + $0x720] sm:$0xff]  ;;  %622 = vmatpush2.msra.mxu1 %v322_v23  ;;  %552 = vmatprep.subr.mxu0 %v191_v24  ;;  %v145_v23 = vld [vmem:[#allocation5 + $0x1b8] sm:$0xff] }
  0x6e   :  { %v187_v28 = vld [vmem:[#allocation5 + $0x308] sm:$0xff]  ;;  %623 = vmatprep.subr.mxu1 %v319_v25  ;;  %v186_v30 = vld [vmem:[#allocation5 + $0x300] sm:$0xff]  ;;  %553 = vmatpush2.msra.mxu0 %v190_v26  ;;  %v144_v25 = vld [vmem:[#allocation5 + $0x1b0] sm:$0xff] }
  0x6f   :  { %v315_v29 = vld [vmem:[#allocation5 + $0x708] sm:$0xff]  ;;  %v314_v31 = vld [vmem:[#allocation5 + $0x700] sm:$0xff]  ;;  %624 = vmatpush2.msra.mxu1 %v318_v27  ;;  %554 = vmatprep.subr.mxu0 %v187_v28  ;;  %v141_v27 = vld [vmem:[#allocation5 + $0x198] sm:$0xff] }
  0x70   :  { %v183_v32 = vld [vmem:[#allocation5 + $0x2e8] sm:$0xff]  ;;  %625 = vmatprep.subr.mxu1 %v315_v29  ;;  %v182_v34 = vld [vmem:[#allocation5 + $0x2e0] sm:$0xff]  ;;  %555 = vmatpush2.msra.mxu0 %v186_v30  ;;  %v140_v29 = vld [vmem:[#allocation5 + $0x190] sm:$0xff] }
  0x71   :  { %v311_v33 = vld [vmem:[#allocation5 + $0x6e8] sm:$0xff]  ;;  %v310_v35 = vld [vmem:[#allocation5 + $0x6e0] sm:$0xff]  ;;  %626 = vmatpush2.msra.mxu1 %v314_v31  ;;  %556 = vmatprep.subr.mxu0 %v183_v32  ;;  %v137_v31 = vld [vmem:[#allocation5 + $0x178] sm:$0xff] }
  0x72   :  { %v179_v36 = vld [vmem:[#allocation5 + $0x2c8] sm:$0xff]  ;;  %627 = vmatprep.subr.mxu1 %v311_v33  ;;  %v178_v38 = vld [vmem:[#allocation5 + $0x2c0] sm:$0xff]  ;;  %557 = vmatpush2.msra.mxu0 %v182_v34  ;;  %v136_v33 = vld [vmem:[#allocation5 + $0x170] sm:$0xff] }
  0x73   :  { %v307_v37 = vld [vmem:[#allocation5 + $0x6c8] sm:$0xff]  ;;  %v306_v39 = vld [vmem:[#allocation5 + $0x6c0] sm:$0xff]  ;;  %628 = vmatpush2.msra.mxu1 %v310_v35  ;;  %558 = vmatprep.subr.mxu0 %v179_v36  ;;  %v133_v35 = vld [vmem:[#allocation5 + $0x158] sm:$0xff] }
  0x74   :  { %v175_v40 = vld [vmem:[#allocation5 + $0x2a8] sm:$0xff]  ;;  %629 = vmatprep.subr.mxu1 %v307_v37  ;;  %v174_v42 = vld [vmem:[#allocation5 + $0x2a0] sm:$0xff]  ;;  %559 = vmatpush2.msra.mxu0 %v178_v38  ;;  %v132_v37 = vld [vmem:[#allocation5 + $0x150] sm:$0xff] }
  0x75   :  { %v303_v41 = vld [vmem:[#allocation5 + $0x6a8] sm:$0xff]  ;;  %v302_v43 = vld [vmem:[#allocation5 + $0x6a0] sm:$0xff]  ;;  %630 = vmatpush2.msra.mxu1 %v306_v39  ;;  %560 = vmatprep.subr.mxu0 %v175_v40  ;;  %v129_v39 = vld [vmem:[#allocation5 + $0x138] sm:$0xff] }
  0x76   :  { %v171_v44 = vld [vmem:[#allocation5 + $0x288] sm:$0xff]  ;;  %631 = vmatprep.subr.mxu1 %v303_v41  ;;  %v170_v46 = vld [vmem:[#allocation5 + $0x280] sm:$0xff]  ;;  %561 = vmatpush2.msra.mxu0 %v174_v42  ;;  %v128_v41 = vld [vmem:[#allocation5 + $0x130] sm:$0xff] }
  0x77   :  { %v299_v45 = vld [vmem:[#allocation5 + $0x688] sm:$0xff]  ;;  %v298_v47 = vld [vmem:[#allocation5 + $0x680] sm:$0xff]  ;;  %632 = vmatpush2.msra.mxu1 %v302_v43  ;;  %562 = vmatprep.subr.mxu0 %v171_v44  ;;  %v125_v43 = vld [vmem:[#allocation5 + $0x118] sm:$0xff] }
  0x78   :  { %v167_v48 = vld [vmem:[#allocation5 + $0x268] sm:$0xff]  ;;  %633 = vmatprep.subr.mxu1 %v299_v45  ;;  %v166_v50 = vld [vmem:[#allocation5 + $0x260] sm:$0xff]  ;;  %563 = vmatpush2.msra.mxu0 %v170_v46  ;;  %v124_v45 = vld [vmem:[#allocation5 + $0x110] sm:$0xff] }
  0x79   :  { %v295_v49 = vld [vmem:[#allocation5 + $0x668] sm:$0xff]  ;;  %v294_v51 = vld [vmem:[#allocation5 + $0x660] sm:$0xff]  ;;  %634 = vmatpush2.msra.mxu1 %v298_v47  ;;  %564 = vmatprep.subr.mxu0 %v167_v48  ;;  %v121_v47 = vld [vmem:[#allocation5 + $0xf8] sm:$0xff] }
  0x7a   :  { %v163_v52 = vld [vmem:[#allocation5 + $0x248] sm:$0xff]  ;;  %635 = vmatprep.subr.mxu1 %v295_v49  ;;  %v162_v54 = vld [vmem:[#allocation5 + $0x240] sm:$0xff]  ;;  %565 = vmatpush2.msra.mxu0 %v166_v50  ;;  %v120_v49 = vld [vmem:[#allocation5 + $0xf0] sm:$0xff] }
  0x7b   :  { %v291_v53 = vld [vmem:[#allocation5 + $0x648] sm:$0xff]  ;;  %v290_v55 = vld [vmem:[#allocation5 + $0x640] sm:$0xff]  ;;  %636 = vmatpush2.msra.mxu1 %v294_v51  ;;  %566 = vmatprep.subr.mxu0 %v163_v52  ;;  %v117_v51 = vld [vmem:[#allocation5 + $0xd8] sm:$0xff] }
  0x7c   :  { %v159_v56 = vld [vmem:[#allocation5 + $0x228] sm:$0xff]  ;;  %637 = vmatprep.subr.mxu1 %v291_v53  ;;  %v158_v58 = vld [vmem:[#allocation5 + $0x220] sm:$0xff]  ;;  %567 = vmatpush2.msra.mxu0 %v162_v54  ;;  %v116_v53 = vld [vmem:[#allocation5 + $0xd0] sm:$0xff] }
  0x7d   :  { %v287_v57 = vld [vmem:[#allocation5 + $0x628] sm:$0xff]  ;;  %v286_v59 = vld [vmem:[#allocation5 + $0x620] sm:$0xff]  ;;  %638 = vmatpush2.msra.mxu1 %v290_v55  ;;  %568 = vmatprep.subr.mxu0 %v159_v56  ;;  %v113_v55 = vld [vmem:[#allocation5 + $0xb8] sm:$0xff] }
  0x7e   :  { %v155_v60 = vld [vmem:[#allocation5 + $0x208] sm:$0xff]  ;;  %639 = vmatprep.subr.mxu1 %v287_v57  ;;  %v154_v62 = vld [vmem:[#allocation5 + $0x200] sm:$0xff]  ;;  %569 = vmatpush2.msra.mxu0 %v158_v58  ;;  %v112_v57 = vld [vmem:[#allocation5 + $0xb0] sm:$0xff] }
  0x7f   :  { %v283_v61 = vld [vmem:[#allocation5 + $0x608] sm:$0xff]  ;;  %640 = vmatpush2.msra.mxu1 %v286_v59  ;;  %v282_v0 = vld [vmem:[#allocation5 + $0x600] sm:$0xff]  ;;  %570 = vmatprep.subr.mxu0 %v155_v60  ;;  %v109_v59 = vld [vmem:[#allocation5 + $0x98] sm:$0xff] }
  0x80   :  { %v86_v1 = vld [vmem:[#allocation2 + $0x18] sm:$0xff]  ;;  %641 = vmatprep.subr.mxu1 %v283_v61  ;;  %v1582_v2 = vld [vmem:[#allocation2] sm:$0xff]  ;;  %571 = vmatpush2.msra.mxu0 %v154_v62  ;;  %v108_v61 = vld [vmem:[#allocation5 + $0x90] sm:$0xff] }
  0x81   :  { %572 = vmatprep.mubr.f32.mxu0 %v1580_v63  ;;  %v407_v4 = vld [vmem:[#allocation5 + $0x9e8] sm:$0xff]  ;;  %642 = vmatpush2.msra.mxu1 %v282_v0  ;;  %v406_v6 = vld [vmem:[#allocation5 + $0x9e0] sm:$0xff]  ;;  %v105_v0 = vld [vmem:[#allocation5 + $0x78] sm:$0xff] }
  0x82   :  { %v479_v5 = vld [vmem:[#allocation5 + $0xc28] sm:$0xff]  ;;  %643 = vmatprep.mubr.f32.mxu1 %v86_v1  ;;  %v478_v7 = vld [vmem:[#allocation5 + $0xc20] sm:$0xff]  ;;  %573 = vmatmul.mubr.f32.vlgmr.msra.gmra.mxu0 %v1582_v2 }
  0x83   :  { %644 = vmatmul.mubr.f32.vlgmr.msra.gmra.mxu1 %v85_v3  ;;  %v403_v8 = vld [vmem:[#allocation5 + $0x9c8] sm:$0xff]  ;;  %650 = vmatprep.subr.mxu0 %v407_v4  ;;  %v402_v10 = vld [vmem:[#allocation5 + $0x9c0] sm:$0xff]  ;;  %v104_v3 = vld [vmem:[#allocation5 + $0x70] sm:$0xff] }
  0x84   :  { %v475_v9 = vld [vmem:[#allocation5 + $0xc08] sm:$0xff]  ;;  %749 = vmatprep.subr.mxu1 %v479_v5  ;;  %v474_v11 = vld [vmem:[#allocation5 + $0xc00] sm:$0xff]  ;;  %651 = vmatpush1.msra.mxu0 %v406_v6  ;;  %v101_v5 = vld [vmem:[#allocation5 + $0x58] sm:$0xff] }
  0x85   :  { %750 = vmatpush1.msra.mxu1 %v478_v7  ;;  %v399_v12 = vld [vmem:[#allocation5 + $0x9a8] sm:$0xff]  ;;  %652 = vmatprep.subr.mxu0 %v403_v8  ;;  %v398_v15 = vld [vmem:[#allocation5 + $0x9a0] sm:$0xff]  ;;  %v100_v7 = vld [vmem:[#allocation5 + $0x50] sm:$0xff] }
  0x86   :  { %751 = vmatprep.subr.mxu1 %v475_v9  ;;  %653 = vmatpush1.msra.mxu0 %v402_v10  ;;  %v395_v18 = vld [vmem:[#allocation5 + $0x988] sm:$0xff]  ;;  %v394_v20 = vld [vmem:[#allocation5 + $0x980] sm:$0xff]  ;;  %v97_v9 = vld [vmem:[#allocation5 + $0x38] sm:$0xff] }
  0x87   :  { %752 = vmatpush1.msra.mxu1 %v474_v11  ;;  %785 = vmatprep.mubr.f32.mxu1 %v1533_v17  ;;  %v391_v22 = vld [vmem:[#allocation5 + $0x968] sm:$0xff]  ;;  %v390_v24 = vld [vmem:[#allocation5 + $0x960] sm:$0xff]  ;;  %v96_v11 = vld [vmem:[#allocation5 + $0x30] sm:$0xff] }
  0x88   :  { %654 = vmatprep.subr.mxu0 %v399_v12  ;;  %1309 = vmatmul.mubr.msk.f32.vlgmr.msra.gmra.mxu1 %vm504_vm0, %v89_v13  ;;  %v387_v26 = vld [vmem:[#allocation5 + $0x948] sm:$0xff]  ;;  %v386_v28 = vld [vmem:[#allocation5 + $0x940] sm:$0xff]  ;;  %v93_v13 = vld [vmem:[#allocation5 + $0x18] sm:$0xff] }
  0x89   :  { %792 = vmatprep.subr.mxu1 %v153_v14  ;;  %655 = vmatpush1.msra.mxu0 %v398_v15  ;;  %v383_v30 = vld [vmem:[#allocation5 + $0x928] sm:$0xff]  ;;  %v382_v32 = vld [vmem:[#allocation5 + $0x920] sm:$0xff]  ;;  %v92_v15 = vld [vmem:[#allocation5 + $0x10] sm:$0xff] }
  0x8a   :  { %793 = vmatpush1.msra.mxu1 %v152_v16  ;;  %656 = vmatprep.subr.mxu0 %v395_v18  ;;  %v379_v34 = vld [vmem:[#allocation5 + $0x908] sm:$0xff]  ;;  %v378_v36 = vld [vmem:[#allocation5 + $0x900] sm:$0xff]  ;;  %v217_v18 = vld [vmem:[#allocation5 + $0x3f8] sm:$0xff] }
  0x8b   :  { %794 = vmatprep.subr.mxu1 %v149_v19  ;;  %657 = vmatpush1.msra.mxu0 %v394_v20  ;;  %v375_v38 = vld [vmem:[#allocation5 + $0x8e8] sm:$0xff]  ;;  %v374_v40 = vld [vmem:[#allocation5 + $0x8e0] sm:$0xff]  ;;  %v216_v20 = vld [vmem:[#allocation5 + $0x3f0] sm:$0xff] }
  0x8c   :  { %795 = vmatpush1.msra.mxu1 %v148_v21  ;;  %658 = vmatprep.subr.mxu0 %v391_v22  ;;  %v371_v42 = vld [vmem:[#allocation5 + $0x8c8] sm:$0xff]  ;;  %v370_v44 = vld [vmem:[#allocation5 + $0x8c0] sm:$0xff]  ;;  %v213_v22 = vld [vmem:[#allocation5 + $0x3d8] sm:$0xff] }
  0x8d   :  { %796 = vmatprep.subr.mxu1 %v145_v23  ;;  %659 = vmatpush1.msra.mxu0 %v390_v24  ;;  %v367_v46 = vld [vmem:[#allocation5 + $0x8a8] sm:$0xff]  ;;  %v366_v48 = vld [vmem:[#allocation5 + $0x8a0] sm:$0xff]  ;;  %v212_v24 = vld [vmem:[#allocation5 + $0x3d0] sm:$0xff] }
  0x8e   :  { %797 = vmatpush1.msra.mxu1 %v144_v25  ;;  %660 = vmatprep.subr.mxu0 %v387_v26  ;;  %v363_v50 = vld [vmem:[#allocation5 + $0x888] sm:$0xff]  ;;  %v362_v52 = vld [vmem:[#allocation5 + $0x880] sm:$0xff]  ;;  %v209_v26 = vld [vmem:[#allocation5 + $0x3b8] sm:$0xff] }
  0x8f   :  { %798 = vmatprep.subr.mxu1 %v141_v27  ;;  %661 = vmatpush1.msra.mxu0 %v386_v28  ;;  %v359_v54 = vld [vmem:[#allocation5 + $0x868] sm:$0xff]  ;;  %v358_v56 = vld [vmem:[#allocation5 + $0x860] sm:$0xff]  ;;  %v208_v28 = vld [vmem:[#allocation5 + $0x3b0] sm:$0xff] }
  0x90   :  { %799 = vmatpush1.msra.mxu1 %v140_v29  ;;  %662 = vmatprep.subr.mxu0 %v383_v30  ;;  %v355_v58 = vld [vmem:[#allocation5 + $0x848] sm:$0xff]  ;;  %v354_v60 = vld [vmem:[#allocation5 + $0x840] sm:$0xff]  ;;  %v205_v30 = vld [vmem:[#allocation5 + $0x398] sm:$0xff] }
  0x91   :  { %800 = vmatprep.subr.mxu1 %v137_v31  ;;  %663 = vmatpush1.msra.mxu0 %v382_v32  ;;  %v351_v62 = vld [vmem:[#allocation5 + $0x828] sm:$0xff]  ;;  %v350_v1 = vld [vmem:[#allocation5 + $0x820] sm:$0xff]  ;;  %v204_v32 = vld [vmem:[#allocation5 + $0x390] sm:$0xff] }
  0x92   :  { %801 = vmatpush1.msra.mxu1 %v136_v33  ;;  %664 = vmatprep.subr.mxu0 %v379_v34  ;;  %v347_v4 = vld [vmem:[#allocation5 + $0x808] sm:$0xff]  ;;  %v346_v6 = vld [vmem:[#allocation5 + $0x800] sm:$0xff]  ;;  %v201_v34 = vld [vmem:[#allocation5 + $0x378] sm:$0xff] }
  0x93   :  { %802 = vmatprep.subr.mxu1 %v133_v35  ;;  %665 = vmatpush1.msra.mxu0 %v378_v36  ;;  %v471_v8 = vld [vmem:[#allocation5 + $0xbe8] sm:$0xff]  ;;  %v470_v10 = vld [vmem:[#allocation5 + $0xbe0] sm:$0xff]  ;;  %v200_v36 = vld [vmem:[#allocation5 + $0x370] sm:$0xff] }
  0x94   :  { %803 = vmatpush1.msra.mxu1 %v132_v37  ;;  %666 = vmatprep.subr.mxu0 %v375_v38  ;;  %v467_v12 = vld [vmem:[#allocation5 + $0xbc8] sm:$0xff]  ;;  %v466_v14 = vld [vmem:[#allocation5 + $0xbc0] sm:$0xff]  ;;  %v197_v38 = vld [vmem:[#allocation5 + $0x358] sm:$0xff] }
  0x95   :  { %804 = vmatprep.subr.mxu1 %v129_v39  ;;  %667 = vmatpush1.msra.mxu0 %v374_v40  ;;  %v463_v16 = vld [vmem:[#allocation5 + $0xba8] sm:$0xff]  ;;  %v462_v19 = vld [vmem:[#allocation5 + $0xba0] sm:$0xff]  ;;  %v196_v40 = vld [vmem:[#allocation5 + $0x350] sm:$0xff] }
  0x96   :  { %805 = vmatpush1.msra.mxu1 %v128_v41  ;;  %668 = vmatprep.subr.mxu0 %v371_v42  ;;  %v459_v21 = vld [vmem:[#allocation5 + $0xb88] sm:$0xff]  ;;  %v458_v23 = vld [vmem:[#allocation5 + $0xb80] sm:$0xff]  ;;  %v193_v42 = vld [vmem:[#allocation5 + $0x338] sm:$0xff] }
  0x97   :  { %806 = vmatprep.subr.mxu1 %v125_v43  ;;  %669 = vmatpush1.msra.mxu0 %v370_v44  ;;  %v455_v25 = vld [vmem:[#allocation5 + $0xb68] sm:$0xff]  ;;  %v454_v27 = vld [vmem:[#allocation5 + $0xb60] sm:$0xff]  ;;  %v192_v44 = vld [vmem:[#allocation5 + $0x330] sm:$0xff] }
  0x98   :  { %807 = vmatpush1.msra.mxu1 %v124_v45  ;;  %670 = vmatprep.subr.mxu0 %v367_v46  ;;  %v451_v29 = vld [vmem:[#allocation5 + $0xb48] sm:$0xff]  ;;  %v450_v31 = vld [vmem:[#allocation5 + $0xb40] sm:$0xff]  ;;  %v189_v46 = vld [vmem:[#allocation5 + $0x318] sm:$0xff] }
  0x99   :  { %808 = vmatprep.subr.mxu1 %v121_v47  ;;  %671 = vmatpush1.msra.mxu0 %v366_v48  ;;  %v447_v33 = vld [vmem:[#allocation5 + $0xb28] sm:$0xff]  ;;  %v446_v35 = vld [vmem:[#allocation5 + $0xb20] sm:$0xff]  ;;  %v188_v48 = vld [vmem:[#allocation5 + $0x310] sm:$0xff] }
  0x9a   :  { %809 = vmatpush1.msra.mxu1 %v120_v49  ;;  %672 = vmatprep.subr.mxu0 %v363_v50  ;;  %v443_v37 = vld [vmem:[#allocation5 + $0xb08] sm:$0xff]  ;;  %v442_v39 = vld [vmem:[#allocation5 + $0xb00] sm:$0xff]  ;;  %v185_v50 = vld [vmem:[#allocation5 + $0x2f8] sm:$0xff] }
  0x9b   :  { %810 = vmatprep.subr.mxu1 %v117_v51  ;;  %673 = vmatpush1.msra.mxu0 %v362_v52  ;;  %v439_v41 = vld [vmem:[#allocation5 + $0xae8] sm:$0xff]  ;;  %v438_v43 = vld [vmem:[#allocation5 + $0xae0] sm:$0xff]  ;;  %v184_v52 = vld [vmem:[#allocation5 + $0x2f0] sm:$0xff] }
  0x9c   :  { %811 = vmatpush1.msra.mxu1 %v116_v53  ;;  %674 = vmatprep.subr.mxu0 %v359_v54  ;;  %v435_v45 = vld [vmem:[#allocation5 + $0xac8] sm:$0xff]  ;;  %v434_v47 = vld [vmem:[#allocation5 + $0xac0] sm:$0xff]  ;;  %v181_v54 = vld [vmem:[#allocation5 + $0x2d8] sm:$0xff] }
  0x9d   :  { %812 = vmatprep.subr.mxu1 %v113_v55  ;;  %675 = vmatpush1.msra.mxu0 %v358_v56  ;;  %v431_v49 = vld [vmem:[#allocation5 + $0xaa8] sm:$0xff]  ;;  %v430_v51 = vld [vmem:[#allocation5 + $0xaa0] sm:$0xff]  ;;  %v180_v56 = vld [vmem:[#allocation5 + $0x2d0] sm:$0xff] }
  0x9e   :  { %813 = vmatpush1.msra.mxu1 %v112_v57  ;;  %676 = vmatprep.subr.mxu0 %v355_v58  ;;  %v427_v53 = vld [vmem:[#allocation5 + $0xa88] sm:$0xff]  ;;  %v426_v55 = vld [vmem:[#allocation5 + $0xa80] sm:$0xff]  ;;  %v177_v58 = vld [vmem:[#allocation5 + $0x2b8] sm:$0xff] }
  0x9f   :  { %814 = vmatprep.subr.mxu1 %v109_v59  ;;  %677 = vmatpush1.msra.mxu0 %v354_v60  ;;  %v423_v57 = vld [vmem:[#allocation5 + $0xa68] sm:$0xff]  ;;  %v422_v59 = vld [vmem:[#allocation5 + $0xa60] sm:$0xff]  ;;  %v176_v60 = vld [vmem:[#allocation5 + $0x2b0] sm:$0xff] }
  0xa0   :  { %815 = vmatpush1.msra.mxu1 %v108_v61  ;;  %678 = vmatprep.subr.mxu0 %v351_v62  ;;  %v419_v61 = vld [vmem:[#allocation5 + $0xa48] sm:$0xff]  ;;  %v173_v62 = vld [vmem:[#allocation5 + $0x298] sm:$0xff] }
  0xa1   :  { %816 = vmatprep.subr.mxu1 %v105_v0  ;;  %679 = vmatpush1.msra.mxu0 %v350_v1  ;;  %v418_v0 = vld [vmem:[#allocation5 + $0xa40] sm:$0xff]  ;;  %v172_v1 = vld [vmem:[#allocation5 + $0x290] sm:$0xff] }
  0xa2   :  { %817 = vmatpush1.msra.mxu1 %v104_v3  ;;  %680 = vmatprep.subr.mxu0 %v347_v4  ;;  %v415_v3 = vld [vmem:[#allocation5 + $0xa28] sm:$0xff]  ;;  %v169_v4 = vld [vmem:[#allocation5 + $0x278] sm:$0xff] }
  0xa3   :  { %818 = vmatprep.subr.mxu1 %v101_v5  ;;  %681 = vmatpush1.msra.mxu0 %v346_v6  ;;  %v414_v5 = vld [vmem:[#allocation5 + $0xa20] sm:$0xff]  ;;  %v168_v6 = vld [vmem:[#allocation5 + $0x270] sm:$0xff] }
  0xa4   :  { %819 = vmatpush1.msra.mxu1 %v100_v7  ;;  %682 = vmatprep.subr.mxu0 %v471_v8  ;;  %v411_v7 = vld [vmem:[#allocation5 + $0xa08] sm:$0xff]  ;;  %v165_v8 = vld [vmem:[#allocation5 + $0x258] sm:$0xff] }
  0xa5   :  { %820 = vmatprep.subr.mxu1 %v97_v9  ;;  %683 = vmatpush2.msra.mxu0 %v470_v10  ;;  %v410_v9 = vld [vmem:[#allocation5 + $0xa00] sm:$0xff]  ;;  %v1588_v10 = vld [vmem:[#allocation2 + $0x28] sm:$0xff] }
  0xa6   :  { %821 = vmatpush1.msra.mxu1 %v96_v11  ;;  %684 = vmatprep.subr.mxu0 %v467_v12  ;;  %v164_v11 = vld [vmem:[#allocation5 + $0x250] sm:$0xff]  ;;  %v1590_v12 = vld [vmem:[#allocation2 + $0x20] sm:$0xff] }
  0xa7   :  { %822 = vmatprep.subr.mxu1 %v93_v13  ;;  %685 = vmatpush2.msra.mxu0 %v466_v14  ;;  %v161_v13 = vld [vmem:[#allocation5 + $0x238] sm:$0xff] }
  0xa8   :  { %823 = vmatpush1.msra.mxu1 %v92_v15  ;;  %686 = vmatprep.subr.mxu0 %v463_v16  ;;  %v281_v14 = vld [vmem:[#allocation5 + $0x5f8] sm:$0xff]  ;;  %v160_v15 = vld [vmem:[#allocation5 + $0x230] sm:$0xff] }
  0xa9   :  { %824 = vmatprep.subr.mxu1 %v217_v18  ;;  %687 = vmatpush2.msra.mxu0 %v462_v19  ;;  %v280_v16 = vld [vmem:[#allocation5 + $0x5f0] sm:$0xff]  ;;  %v157_v18 = vld [vmem:[#allocation5 + $0x218] sm:$0xff] }
  0xaa   :  { %825 = vmatpush2.msra.mxu1 %v216_v20  ;;  %688 = vmatprep.subr.mxu0 %v459_v21  ;;  %v277_v19 = vld [vmem:[#allocation5 + $0x5d8] sm:$0xff]  ;;  %v156_v20 = vld [vmem:[#allocation5 + $0x210] sm:$0xff] }
  0xab   :  { %826 = vmatprep.subr.mxu1 %v213_v22  ;;  %689 = vmatpush2.msra.mxu0 %v458_v23  ;;  %v276_v21 = vld [vmem:[#allocation5 + $0x5d0] sm:$0xff]  ;;  %v273_v22 = vld [vmem:[#allocation5 + $0x5b8] sm:$0xff] }
  0xac   :  { %827 = vmatpush2.msra.mxu1 %v212_v24  ;;  %690 = vmatprep.subr.mxu0 %v455_v25  ;;  %v409_v23 = vld [vmem:[#allocation5 + $0x9f8] sm:$0xff]  ;;  %v272_v24 = vld [vmem:[#allocation5 + $0x5b0] sm:$0xff] }
  0xad   :  { %828 = vmatprep.subr.mxu1 %v209_v26  ;;  %691 = vmatpush2.msra.mxu0 %v454_v27  ;;  %v408_v25 = vld [vmem:[#allocation5 + $0x9f0] sm:$0xff]  ;;  %v269_v26 = vld [vmem:[#allocation5 + $0x598] sm:$0xff] }
  0xae   :  { %829 = vmatpush2.msra.mxu1 %v208_v28  ;;  %692 = vmatprep.subr.mxu0 %v451_v29  ;;  %v405_v27 = vld [vmem:[#allocation5 + $0x9d8] sm:$0xff]  ;;  %v268_v28 = vld [vmem:[#allocation5 + $0x590] sm:$0xff] }
  0xaf   :  { %830 = vmatprep.subr.mxu1 %v205_v30  ;;  %693 = vmatpush2.msra.mxu0 %v450_v31  ;;  %v404_v29 = vld [vmem:[#allocation5 + $0x9d0] sm:$0xff]  ;;  %v265_v30 = vld [vmem:[#allocation5 + $0x578] sm:$0xff] }
  0xb0   :  { %831 = vmatpush2.msra.mxu1 %v204_v32  ;;  %694 = vmatprep.subr.mxu0 %v447_v33  ;;  %v401_v31 = vld [vmem:[#allocation5 + $0x9b8] sm:$0xff]  ;;  %v264_v32 = vld [vmem:[#allocation5 + $0x570] sm:$0xff] }
  0xb1   :  { %832 = vmatprep.subr.mxu1 %v201_v34  ;;  %695 = vmatpush2.msra.mxu0 %v446_v35  ;;  %v400_v33 = vld [vmem:[#allocation5 + $0x9b0] sm:$0xff]  ;;  %v397_v34 = vld [vmem:[#allocation5 + $0x998] sm:$0xff] }
  0xb2   :  { %833 = vmatpush2.msra.mxu1 %v200_v36  ;;  %696 = vmatprep.subr.mxu0 %v443_v37  ;;  %v396_v35 = vld [vmem:[#allocation5 + $0x990] sm:$0xff]  ;;  %v257_v36 = vld [vmem:[#allocation5 + $0x538] sm:$0xff] }
  0xb3   :  { %834 = vmatprep.subr.mxu1 %v197_v38  ;;  %697 = vmatpush2.msra.mxu0 %v442_v39  ;;  %v393_v37 = vld [vmem:[#allocation5 + $0x978] sm:$0xff]  ;;  %v256_v38 = vld [vmem:[#allocation5 + $0x530] sm:$0xff] }
  0xb4   :  { %835 = vmatpush2.msra.mxu1 %v196_v40  ;;  %698 = vmatprep.subr.mxu0 %v439_v41  ;;  %v392_v39 = vld [vmem:[#allocation5 + $0x970] sm:$0xff]  ;;  %v253_v40 = vld [vmem:[#allocation5 + $0x518] sm:$0xff] }
  0xb5   :  { %836 = vmatprep.subr.mxu1 %v193_v42  ;;  %699 = vmatpush2.msra.mxu0 %v438_v43  ;;  %v389_v41 = vld [vmem:[#allocation5 + $0x958] sm:$0xff]  ;;  %v252_v42 = vld [vmem:[#allocation5 + $0x510] sm:$0xff] }
  0xb6   :  { %837 = vmatpush2.msra.mxu1 %v192_v44  ;;  %700 = vmatprep.subr.mxu0 %v435_v45  ;;  %v388_v43 = vld [vmem:[#allocation5 + $0x950] sm:$0xff]  ;;  %v249_v44 = vld [vmem:[#allocation5 + $0x4f8] sm:$0xff] }
  0xb7   :  { %838 = vmatprep.subr.mxu1 %v189_v46  ;;  %701 = vmatpush2.msra.mxu0 %v434_v47  ;;  %v385_v45 = vld [vmem:[#allocation5 + $0x938] sm:$0xff]  ;;  %v248_v46 = vld [vmem:[#allocation5 + $0x4f0] sm:$0xff] }
  0xb8   :  { %839 = vmatpush2.msra.mxu1 %v188_v48  ;;  %702 = vmatprep.subr.mxu0 %v431_v49  ;;  %v384_v47 = vld [vmem:[#allocation5 + $0x930] sm:$0xff]  ;;  %v245_v48 = vld [vmem:[#allocation5 + $0x4d8] sm:$0xff] }
  0xb9   :  { %840 = vmatprep.subr.mxu1 %v185_v50  ;;  %703 = vmatpush2.msra.mxu0 %v430_v51  ;;  %v381_v49 = vld [vmem:[#allocation5 + $0x918] sm:$0xff]  ;;  %v244_v50 = vld [vmem:[#allocation5 + $0x4d0] sm:$0xff] }
  0xba   :  { %841 = vmatpush2.msra.mxu1 %v184_v52  ;;  %704 = vmatprep.subr.mxu0 %v427_v53  ;;  %v380_v51 = vld [vmem:[#allocation5 + $0x910] sm:$0xff]  ;;  %v241_v52 = vld [vmem:[#allocation5 + $0x4b8] sm:$0xff] }
  0xbb   :  { %842 = vmatprep.subr.mxu1 %v181_v54  ;;  %705 = vmatpush2.msra.mxu0 %v426_v55  ;;  %v377_v53 = vld [vmem:[#allocation5 + $0x8f8] sm:$0xff]  ;;  %v240_v54 = vld [vmem:[#allocation5 + $0x4b0] sm:$0xff] }
  0xbc   :  { %843 = vmatpush2.msra.mxu1 %v180_v56  ;;  %706 = vmatprep.subr.mxu0 %v423_v57  ;;  %v376_v55 = vld [vmem:[#allocation5 + $0x8f0] sm:$0xff]  ;;  %v237_v56 = vld [vmem:[#allocation5 + $0x498] sm:$0xff] }
  0xbd   :  { %844 = vmatprep.subr.mxu1 %v177_v58  ;;  %707 = vmatpush2.msra.mxu0 %v422_v59  ;;  %v373_v57 = vld [vmem:[#allocation5 + $0x8d8] sm:$0xff]  ;;  %v236_v58 = vld [vmem:[#allocation5 + $0x490] sm:$0xff] }
  0xbe   :  { %845 = vmatpush2.msra.mxu1 %v176_v60  ;;  %708 = vmatprep.subr.mxu0 %v419_v61  ;;  %v372_v59 = vld [vmem:[#allocation5 + $0x8d0] sm:$0xff]  ;;  %v233_v60 = vld [vmem:[#allocation5 + $0x478] sm:$0xff] }
  0xbf   :  { %846 = vmatprep.subr.mxu1 %v173_v62  ;;  %709 = vmatpush2.msra.mxu0 %v418_v0  ;;  %v369_v61 = vld [vmem:[#allocation5 + $0x8b8] sm:$0xff]  ;;  %v232_v62 = vld [vmem:[#allocation5 + $0x470] sm:$0xff] }
  0xc0   :  { %847 = vmatpush2.msra.mxu1 %v172_v1  ;;  %710 = vmatprep.subr.mxu0 %v415_v3  ;;  %v368_v0 = vld [vmem:[#allocation5 + $0x8b0] sm:$0xff]  ;;  %v229_v1 = vld [vmem:[#allocation5 + $0x458] sm:$0xff] }
  0xc1   :  { %848 = vmatprep.subr.mxu1 %v169_v4  ;;  %711 = vmatpush2.msra.mxu0 %v414_v5  ;;  %v365_v3 = vld [vmem:[#allocation5 + $0x898] sm:$0xff]  ;;  %v228_v4 = vld [vmem:[#allocation5 + $0x450] sm:$0xff] }
  0xc2   :  { %849 = vmatpush2.msra.mxu1 %v168_v6  ;;  %712 = vmatprep.subr.mxu0 %v411_v7  ;;  %v364_v5 = vld [vmem:[#allocation5 + $0x890] sm:$0xff]  ;;  %v225_v6 = vld [vmem:[#allocation5 + $0x438] sm:$0xff] }
  0xc3   :  { %850 = vmatprep.subr.mxu1 %v165_v8  ;;  %713 = vmatpush2.msra.mxu0 %v410_v9  ;;  %v361_v7 = vld [vmem:[#allocation5 + $0x878] sm:$0xff]  ;;  %v224_v8 = vld [vmem:[#allocation5 + $0x430] sm:$0xff] }
  0xc4   :  { %714 = vmatprep.mubr.f32.mxu0 %v1588_v10  ;;  %851 = vmatpush2.msra.mxu1 %v164_v11  ;;  %v360_v9 = vld [vmem:[#allocation5 + $0x870] sm:$0xff]  ;;  %v221_v11 = vld [vmem:[#allocation5 + $0x418] sm:$0xff] }
  0xc5   :  { %715 = vmatmul.mubr.f32.vlgmr.msra.gmra.mxu0 %v1590_v12  ;;  %852 = vmatprep.subr.mxu1 %v161_v13  ;;  %v357_v13 = vld [vmem:[#allocation5 + $0x858] sm:$0xff] }
  0xc6   :  { %863 = vmatprep.subr.mxu0 %v281_v14  ;;  %853 = vmatpush2.msra.mxu1 %v160_v15  ;;  %v220_v14 = vld [vmem:[#allocation5 + $0x410] sm:$0xff] }
  0xc7   :  { %864 = vmatpush1.msra.mxu0 %v280_v16  ;;  %854 = vmatprep.subr.mxu1 %v157_v18  ;;  %v356_v15 = vld [vmem:[#allocation5 + $0x850] sm:$0xff]  ;;  %v345_v16 = vld [vmem:[#allocation5 + $0x7f8] sm:$0xff] }
  0xc8   :  { %865 = vmatprep.subr.mxu0 %v277_v19  ;;  %855 = vmatpush2.msra.mxu1 %v156_v20  ;;  %v353_v18 = vld [vmem:[#allocation5 + $0x838] sm:$0xff]  ;;  %v344_v19 = vld [vmem:[#allocation5 + $0x7f0] sm:$0xff] }
  0xc9   :  { %856 = vmatprep.mubr.f32.mxu1 %v1580_v63  ;;  %866 = vmatpush1.msra.mxu0 %v276_v21  ;;  %v261_v63 = vld [vmem:[#allocation5 + $0x558] sm:$0xff]  ;;  %v352_v20 = vld [vmem:[#allocation5 + $0x830] sm:$0xff] }
  0xca   :  { %857 = vmatmul.mubr.f32.vlgmr.msra.gmra.mxu1 %v1582_v2  ;;  %867 = vmatprep.subr.mxu0 %v273_v22  ;;  %v260_v2 = vld [vmem:[#allocation5 + $0x550] sm:$0xff]  ;;  %v341_v21 = vld [vmem:[#allocation5 + $0x7d8] sm:$0xff] }
  0xcb   :  { %934 = vmatprep.subr.mxu1 %v409_v23  ;;  %868 = vmatpush1.msra.mxu0 %v272_v24  ;;  %v349_v22 = vld [vmem:[#allocation5 + $0x818] sm:$0xff]  ;;  %v340_v23 = vld [vmem:[#allocation5 + $0x7d0] sm:$0xff] }
  0xcc   :  { %935 = vmatpush1.msra.mxu1 %v408_v25  ;;  %869 = vmatprep.subr.mxu0 %v269_v26  ;;  %v348_v24 = vld [vmem:[#allocation5 + $0x810] sm:$0xff]  ;;  %v337_v25 = vld [vmem:[#allocation5 + $0x7b8] sm:$0xff] }
  0xcd   :  { %936 = vmatprep.subr.mxu1 %v405_v27  ;;  %870 = vmatpush1.msra.mxu0 %v268_v28  ;;  %v473_v26 = vld [vmem:[#allocation5 + $0xbf8] sm:$0xff]  ;;  %v336_v27 = vld [vmem:[#allocation5 + $0x7b0] sm:$0xff] }
  0xce   :  { %937 = vmatpush1.msra.mxu1 %v404_v29  ;;  %871 = vmatprep.subr.mxu0 %v265_v30  ;;  %v472_v28 = vld [vmem:[#allocation5 + $0xbf0] sm:$0xff]  ;;  %v333_v29 = vld [vmem:[#allocation5 + $0x798] sm:$0xff] }
  0xcf   :  { %938 = vmatprep.subr.mxu1 %v401_v31  ;;  %872 = vmatpush1.msra.mxu0 %v264_v32  ;;  %v469_v30 = vld [vmem:[#allocation5 + $0xbd8] sm:$0xff]  ;;  %v332_v31 = vld [vmem:[#allocation5 + $0x790] sm:$0xff] }
  0xd0   :  { %939 = vmatpush1.msra.mxu1 %v400_v33  ;;  %873 = vmatprep.subr.mxu0 %v261_v63  ;;  %v468_v32 = vld [vmem:[#allocation5 + $0xbd0] sm:$0xff]  ;;  %v329_v33 = vld [vmem:[#allocation5 + $0x778] sm:$0xff] }
  0xd1   :  { %940 = vmatprep.subr.mxu1 %v397_v34  ;;  %874 = vmatpush1.msra.mxu0 %v260_v2  ;;  %v465_v63 = vld [vmem:[#allocation5 + $0xbb8] sm:$0xff]  ;;  %v328_v34 = vld [vmem:[#allocation5 + $0x770] sm:$0xff] }
  0xd2   :  { %941 = vmatpush1.msra.mxu1 %v396_v35  ;;  %875 = vmatprep.subr.mxu0 %v257_v36  ;;  %v464_v2 = vld [vmem:[#allocation5 + $0xbb0] sm:$0xff]  ;;  %v325_v35 = vld [vmem:[#allocation5 + $0x758] sm:$0xff] }
  0xd3   :  { %942 = vmatprep.subr.mxu1 %v393_v37  ;;  %876 = vmatpush1.msra.mxu0 %v256_v38  ;;  %v461_v36 = vld [vmem:[#allocation5 + $0xb98] sm:$0xff]  ;;  %v324_v37 = vld [vmem:[#allocation5 + $0x750] sm:$0xff] }
  0xd4   :  { %943 = vmatpush1.msra.mxu1 %v392_v39  ;;  %877 = vmatprep.subr.mxu0 %v253_v40  ;;  %v460_v38 = vld [vmem:[#allocation5 + $0xb90] sm:$0xff]  ;;  %v321_v39 = vld [vmem:[#allocation5 + $0x738] sm:$0xff] }
  0xd5   :  { %944 = vmatprep.subr.mxu1 %v389_v41  ;;  %878 = vmatpush1.msra.mxu0 %v252_v42  ;;  %v457_v40 = vld [vmem:[#allocation5 + $0xb78] sm:$0xff]  ;;  %v320_v41 = vld [vmem:[#allocation5 + $0x730] sm:$0xff] }
  0xd6   :  { %945 = vmatpush1.msra.mxu1 %v388_v43  ;;  %879 = vmatprep.subr.mxu0 %v249_v44  ;;  %v456_v42 = vld [vmem:[#allocation5 + $0xb70] sm:$0xff]  ;;  %v317_v43 = vld [vmem:[#allocation5 + $0x718] sm:$0xff] }
  0xd7   :  { %946 = vmatprep.subr.mxu1 %v385_v45  ;;  %880 = vmatpush1.msra.mxu0 %v248_v46  ;;  %v453_v44 = vld [vmem:[#allocation5 + $0xb58] sm:$0xff]  ;;  %v316_v45 = vld [vmem:[#allocation5 + $0x710] sm:$0xff] }
  0xd8   :  { %947 = vmatpush1.msra.mxu1 %v384_v47  ;;  %881 = vmatprep.subr.mxu0 %v245_v48  ;;  %v452_v46 = vld [vmem:[#allocation5 + $0xb50] sm:$0xff]  ;;  %v313_v47 = vld [vmem:[#allocation5 + $0x6f8] sm:$0xff] }
  0xd9   :  { %948 = vmatprep.subr.mxu1 %v381_v49  ;;  %882 = vmatpush1.msra.mxu0 %v244_v50  ;;  %v449_v48 = vld [vmem:[#allocation5 + $0xb38] sm:$0xff]  ;;  %v312_v49 = vld [vmem:[#allocation5 + $0x6f0] sm:$0xff] }
  0xda   :  { %949 = vmatpush1.msra.mxu1 %v380_v51  ;;  %883 = vmatprep.subr.mxu0 %v241_v52  ;;  %v448_v50 = vld [vmem:[#allocation5 + $0xb30] sm:$0xff]  ;;  %v309_v51 = vld [vmem:[#allocation5 + $0x6d8] sm:$0xff] }
  0xdb   :  { %950 = vmatprep.subr.mxu1 %v377_v53  ;;  %884 = vmatpush1.msra.mxu0 %v240_v54  ;;  %v445_v52 = vld [vmem:[#allocation5 + $0xb18] sm:$0xff]  ;;  %v308_v53 = vld [vmem:[#allocation5 + $0x6d0] sm:$0xff] }
  0xdc   :  { %951 = vmatpush1.msra.mxu1 %v376_v55  ;;  %885 = vmatprep.subr.mxu0 %v237_v56  ;;  %v444_v54 = vld [vmem:[#allocation5 + $0xb10] sm:$0xff]  ;;  %v305_v55 = vld [vmem:[#allocation5 + $0x6b8] sm:$0xff] }
  0xdd   :  { %952 = vmatprep.subr.mxu1 %v373_v57  ;;  %886 = vmatpush1.msra.mxu0 %v236_v58  ;;  %v441_v56 = vld [vmem:[#allocation5 + $0xaf8] sm:$0xff]  ;;  %v304_v57 = vld [vmem:[#allocation5 + $0x6b0] sm:$0xff] }
  0xde   :  { %953 = vmatpush1.msra.mxu1 %v372_v59  ;;  %887 = vmatprep.subr.mxu0 %v233_v60  ;;  %v440_v58 = vld [vmem:[#allocation5 + $0xaf0] sm:$0xff]  ;;  %v301_v59 = vld [vmem:[#allocation5 + $0x698] sm:$0xff] }
  0xdf   :  { %954 = vmatprep.subr.mxu1 %v369_v61  ;;  %888 = vmatpush1.msra.mxu0 %v232_v62  ;;  %v437_v60 = vld [vmem:[#allocation5 + $0xad8] sm:$0xff]  ;;  %v300_v61 = vld [vmem:[#allocation5 + $0x690] sm:$0xff] }
  0xe0   :  { %955 = vmatpush1.msra.mxu1 %v368_v0  ;;  %889 = vmatprep.subr.mxu0 %v229_v1  ;;  %v436_v62 = vld [vmem:[#allocation5 + $0xad0] sm:$0xff]  ;;  %v297_v0 = vld [vmem:[#allocation5 + $0x678] sm:$0xff] }
  0xe1   :  { %956 = vmatprep.subr.mxu1 %v365_v3  ;;  %890 = vmatpush1.msra.mxu0 %v228_v4  ;;  %v433_v1 = vld [vmem:[#allocation5 + $0xab8] sm:$0xff]  ;;  %v296_v3 = vld [vmem:[#allocation5 + $0x670] sm:$0xff] }
  0xe2   :  { %957 = vmatpush1.msra.mxu1 %v364_v5  ;;  %891 = vmatprep.subr.mxu0 %v225_v6  ;;  %v432_v4 = vld [vmem:[#allocation5 + $0xab0] sm:$0xff]  ;;  %v293_v5 = vld [vmem:[#allocation5 + $0x658] sm:$0xff] }
  0xe3   :  { %958 = vmatprep.subr.mxu1 %v361_v7  ;;  %892 = vmatpush1.msra.mxu0 %v224_v8  ;;  %v429_v6 = vld [vmem:[#allocation5 + $0xa98] sm:$0xff]  ;;  %v292_v7 = vld [vmem:[#allocation5 + $0x650] sm:$0xff] }
  0xe4   :  { %959 = vmatpush1.msra.mxu1 %v360_v9  ;;  %893 = vmatprep.subr.mxu0 %v221_v11  ;;  %v428_v8 = vld [vmem:[#allocation5 + $0xa90] sm:$0xff]  ;;  %v289_v9 = vld [vmem:[#allocation5 + $0x638] sm:$0xff] }
  0xe5   :  { %960 = vmatprep.subr.mxu1 %v357_v13  ;;  %894 = vmatpush1.msra.mxu0 %v220_v14  ;;  %v425_v11 = vld [vmem:[#allocation5 + $0xa78] sm:$0xff]  ;;  %v288_v13 = vld [vmem:[#allocation5 + $0x630] sm:$0xff] }
  0xe6   :  { %961 = vmatpush1.msra.mxu1 %v356_v15  ;;  %895 = vmatprep.subr.mxu0 %v345_v16  ;;  %v424_v14 = vld [vmem:[#allocation5 + $0xa70] sm:$0xff]  ;;  %v285_v15 = vld [vmem:[#allocation5 + $0x618] sm:$0xff] }
  0xe7   :  { %962 = vmatprep.subr.mxu1 %v353_v18  ;;  %896 = vmatpush2.msra.mxu0 %v344_v19  ;;  %v421_v16 = vld [vmem:[#allocation5 + $0xa58] sm:$0xff]  ;;  %v284_v18 = vld [vmem:[#allocation5 + $0x610] sm:$0xff] }
  0xe8   :  { %963 = vmatpush1.msra.mxu1 %v352_v20  ;;  %897 = vmatprep.subr.mxu0 %v341_v21  ;;  %v420_v19 = vld [vmem:[#allocation5 + $0xa50] sm:$0xff]  ;;  %v417_v20 = vld [vmem:[#allocation5 + $0xa38] sm:$0xff] }
  0xe9   :  { %964 = vmatprep.subr.mxu1 %v349_v22  ;;  %898 = vmatpush2.msra.mxu0 %v340_v23  ;;  %v481_v21 = vld [vmem:[#allocation5 + $0xc38] sm:$0xff]  ;;  %v1393_v22 = vld [vmem:[#allocation2 + $0x18] sm:$0xff]  ;;  %v416_v23 = vld [vmem:[#allocation5 + $0xa30] sm:$0xff] }
  0xea   :  { %965 = vmatpush1.msra.mxu1 %v348_v24  ;;  %899 = vmatprep.subr.mxu0 %v337_v25  ;;  %v480_v24 = vld [vmem:[#allocation5 + $0xc30] sm:$0xff]  ;;  %v1394_v25 = vld [vmem:[#allocation2 + $0x10] sm:$0xff] }
  0xeb   :  { %966 = vmatprep.subr.mxu1 %v473_v26  ;;  %900 = vmatpush2.msra.mxu0 %v336_v27  ;;  %v413_v26 = vld [vmem:[#allocation5 + $0xa18] sm:$0xff] }
  0xec   :  { %967 = vmatpush2.msra.mxu1 %v472_v28  ;;  %901 = vmatprep.subr.mxu0 %v333_v29  ;;  %v477_v27 = vld [vmem:[#allocation5 + $0xc18] sm:$0xff]  ;;  %v412_v28 = vld [vmem:[#allocation5 + $0xa10] sm:$0xff] }
  0xed   :  { %968 = vmatprep.subr.mxu1 %v469_v30  ;;  %902 = vmatpush2.msra.mxu0 %v332_v31  ;;  %v476_v29 = vld [vmem:[#allocation5 + $0xc10] sm:$0xff]  ;;  %v1111_v30 = vld [vmem:[#allocation8 + $0xf8] sm:$0xff] }
  0xee   :  { %969 = vmatpush2.msra.mxu1 %v468_v32  ;;  %903 = vmatprep.subr.mxu0 %v329_v33  ;;  %v1095_v31 = vld [vmem:[#allocation8 + $0x78] sm:$0xff]  ;;  %v1110_v33 = vld [vmem:[#allocation8 + $0xf0] sm:$0xff] }
  0xef   :  { %970 = vmatprep.subr.mxu1 %v465_v63  ;;  %904 = vmatpush2.msra.mxu0 %v328_v34  ;;  %v1395_v32 = vld [vmem:[#allocation2 + $0x30] sm:$0xff]  ;;  %v1109_v34 = vld [vmem:[#allocation8 + $0xe8] sm:$0xff] }
  0xf0   :  { %971 = vmatpush2.msra.mxu1 %v464_v2  ;;  %905 = vmatprep.subr.mxu0 %v325_v35  ;;  %v1094_v63 = vld [vmem:[#allocation8 + $0x70] sm:$0xff]  ;;  %v1143_v2 = vld [vmem:[#allocation8 + $0x1f8] sm:$0xff] }
  0xf1   :  { %972 = vmatprep.subr.mxu1 %v461_v36  ;;  %906 = vmatpush2.msra.mxu0 %v324_v37  ;;  %v1127_v35 = vld [vmem:[#allocation8 + $0x178] sm:$0xff]  ;;  %v1142_v36 = vld [vmem:[#allocation8 + $0x1f0] sm:$0xff] }
  0xf2   :  { %973 = vmatpush2.msra.mxu1 %v460_v38  ;;  %907 = vmatprep.subr.mxu0 %v321_v39  ;;  %v1126_v37 = vld [vmem:[#allocation8 + $0x170] sm:$0xff]  ;;  %v1141_v38 = vld [vmem:[#allocation8 + $0x1e8] sm:$0xff] }
  0xf3   :  { %974 = vmatprep.subr.mxu1 %v457_v40  ;;  %908 = vmatpush2.msra.mxu0 %v320_v41  ;;  %v1125_v39 = vld [vmem:[#allocation8 + $0x168] sm:$0xff]  ;;  %v1107_v40 = vld [vmem:[#allocation8 + $0xd8] sm:$0xff]  ;;  %v1140_v41 = vld [vmem:[#allocation8 + $0x1e0] sm:$0xff] }
  0xf4   :  { %975 = vmatpush2.msra.mxu1 %v456_v42  ;;  %909 = vmatprep.subr.mxu0 %v317_v43  ;;  %v1091_v42 = vld [vmem:[#allocation8 + $0x58] sm:$0xff]  ;;  %v1124_v43 = vld [vmem:[#allocation8 + $0x160] sm:$0xff] }
  0xf5   :  { %976 = vmatprep.subr.mxu1 %v453_v44  ;;  %910 = vmatpush2.msra.mxu0 %v316_v45  ;;  %v1106_v44 = vld [vmem:[#allocation8 + $0xd0] sm:$0xff]  ;;  %v1139_v45 = vld [vmem:[#allocation8 + $0x1d8] sm:$0xff] }
  0xf6   :  { %977 = vmatpush2.msra.mxu1 %v452_v46  ;;  %911 = vmatprep.subr.mxu0 %v313_v47  ;;  %v1090_v46 = vld [vmem:[#allocation8 + $0x50] sm:$0xff]  ;;  %v1123_v47 = vld [vmem:[#allocation8 + $0x158] sm:$0xff] }
  0xf7   :  { %978 = vmatprep.subr.mxu1 %v449_v48  ;;  %912 = vmatpush2.msra.mxu0 %v312_v49  ;;  %v1105_v48 = vld [vmem:[#allocation8 + $0xc8] sm:$0xff]  ;;  %v1138_v49 = vld [vmem:[#allocation8 + $0x1d0] sm:$0xff] }
  0xf8   :  { %979 = vmatpush2.msra.mxu1 %v448_v50  ;;  %913 = vmatprep.subr.mxu0 %v309_v51  ;;  %v1089_v50 = vld [vmem:[#allocation8 + $0x48] sm:$0xff]  ;;  %v1122_v51 = vld [vmem:[#allocation8 + $0x150] sm:$0xff] }
  0xf9   :  { %980 = vmatprep.subr.mxu1 %v445_v52  ;;  %914 = vmatpush2.msra.mxu0 %v308_v53  ;;  %v1104_v52 = vld [vmem:[#allocation8 + $0xc0] sm:$0xff]  ;;  %v1137_v53 = vld [vmem:[#allocation8 + $0x1c8] sm:$0xff] }
  0xfa   :  { %981 = vmatpush2.msra.mxu1 %v444_v54  ;;  %915 = vmatprep.subr.mxu0 %v305_v55  ;;  %v1088_v54 = vld [vmem:[#allocation8 + $0x40] sm:$0xff]  ;;  %v1121_v55 = vld [vmem:[#allocation8 + $0x148] sm:$0xff] }
  0xfb   :  { %982 = vmatprep.subr.mxu1 %v441_v56  ;;  %916 = vmatpush2.msra.mxu0 %v304_v57  ;;  %v1103_v56 = vld [vmem:[#allocation8 + $0xb8] sm:$0xff]  ;;  %v1136_v57 = vld [vmem:[#allocation8 + $0x1c0] sm:$0xff] }
  0xfc   :  { %983 = vmatpush2.msra.mxu1 %v440_v58  ;;  %917 = vmatprep.subr.mxu0 %v301_v59  ;;  %v1087_v58 = vld [vmem:[#allocation8 + $0x38] sm:$0xff]  ;;  %v1120_v59 = vld [vmem:[#allocation8 + $0x140] sm:$0xff] }
  0xfd   :  { %984 = vmatprep.subr.mxu1 %v437_v60  ;;  %918 = vmatpush2.msra.mxu0 %v300_v61  ;;  %v1102_v60 = vld [vmem:[#allocation8 + $0xb0] sm:$0xff]  ;;  %v1135_v61 = vld [vmem:[#allocation8 + $0x1b8] sm:$0xff] }
  0xfe   :  { %985 = vmatpush2.msra.mxu1 %v436_v62  ;;  %919 = vmatprep.subr.mxu0 %v297_v0  ;;  %v1086_v62 = vld [vmem:[#allocation8 + $0x30] sm:$0xff]  ;;  %v1119_v0 = vld [vmem:[#allocation8 + $0x138] sm:$0xff] }
  0xff   :  { %986 = vmatprep.subr.mxu1 %v433_v1  ;;  %920 = vmatpush2.msra.mxu0 %v296_v3  ;;  %v1101_v1 = vld [vmem:[#allocation8 + $0xa8] sm:$0xff] }
 0x100   :  { %987 = vmatpush2.msra.mxu1 %v432_v4  ;;  %921 = vmatprep.subr.mxu0 %v293_v5  ;;  %v1085_v3 = vld [vmem:[#allocation8 + $0x28] sm:$0xff]  ;;  %v1100_v4 = vld [vmem:[#allocation8 + $0xa0] sm:$0xff] }
 0x101   :  { %988 = vmatprep.subr.mxu1 %v429_v6  ;;  %922 = vmatpush2.msra.mxu0 %v292_v7  ;;  %v1084_v5 = vld [vmem:[#allocation8 + $0x20] sm:$0xff]  ;;  %v1099_v6 = vld [vmem:[#allocation8 + $0x98] sm:$0xff] }
 0x102   :  { %989 = vmatpush2.msra.mxu1 %v428_v8  ;;  %923 = vmatprep.subr.mxu0 %v289_v9  ;;  %v1083_v7 = vld [vmem:[#allocation8 + $0x18] sm:$0xff]  ;;  %v1098_v8 = vld [vmem:[#allocation8 + $0x90] sm:$0xff] }
 0x103   :  { %990 = vmatprep.subr.mxu1 %v425_v11  ;;  %924 = vmatpush2.msra.mxu0 %v288_v13  ;;  %v1082_v9 = vld [vmem:[#allocation8 + $0x10] sm:$0xff]  ;;  %v1097_v11 = vld [vmem:[#allocation8 + $0x88] sm:$0xff] }
 0x104   :  { %991 = vmatpush2.msra.mxu1 %v424_v14  ;;  %925 = vmatprep.subr.mxu0 %v285_v15  ;;  %v1081_v13 = vld [vmem:[#allocation8 + $0x8] sm:$0xff]  ;;  %v1096_v14 = vld [vmem:[#allocation8 + $0x80] sm:$0xff] }
 0x105   :  { %992 = vmatprep.subr.mxu1 %v421_v16  ;;  %926 = vmatpush2.msra.mxu0 %v284_v18  ;;  %v1080_v15 = vld [vmem:[#allocation8] sm:$0xff]  ;;  %v1134_v16 = vld [vmem:[#allocation8 + $0x1b0] sm:$0xff] }
 0x106   :  { %927 = vmatprep.mubr.f32.mxu0 %v1393_v22  ;;  %993 = vmatpush2.msra.mxu1 %v420_v19  ;;  %v1118_v18 = vld [vmem:[#allocation8 + $0x130] sm:$0xff]  ;;  %v1133_v19 = vld [vmem:[#allocation8 + $0x1a8] sm:$0xff]  ;;  %v1116_v22 = vld [vmem:[#allocation8 + $0x120] sm:$0xff] }
 0x107   :  { %928 = vmatmul.mubr.f32.vlgmr.msra.gmra.mxu0 %v1394_v25  ;;  %994 = vmatprep.subr.mxu1 %v417_v20  ;;  %v1117_v20 = vld [vmem:[#allocation8 + $0x128] sm:$0xff]  ;;  %v1130_v25 = vld [vmem:[#allocation8 + $0x190] sm:$0xff] }
 0x108   :  { %1033 = vmatprep.subr.mxu0 %v481_v21  ;;  %995 = vmatpush2.msra.mxu1 %v416_v23  ;;  %v1132_v21 = vld [vmem:[#allocation8 + $0x1a0] sm:$0xff]  ;;  %v1131_v23 = vld [vmem:[#allocation8 + $0x198] sm:$0xff] }
 0x109   :  { %1034 = vmatpush1.msra.mxu0 %v480_v24  ;;  %996 = vmatprep.subr.mxu1 %v413_v26  ;;  %v1115_v24 = vld [vmem:[#allocation8 + $0x118] sm:$0xff]  ;;  %v1114_v26 = vld [vmem:[#allocation8 + $0x110] sm:$0xff] }
 0x10a   :  { %1035 = vmatprep.subr.mxu0 %v477_v27  ;;  %997 = vmatpush2.msra.mxu1 %v412_v28  ;;  %v1129_v27 = vld [vmem:[#allocation8 + $0x188] sm:$0xff] }
 0x10b   :  { %998 = vmatprep.mubr.f32.mxu1 %v1588_v10  ;;  %1036 = vmatpush1.msra.mxu0 %v476_v29  ;;  %v1093_v10 = vld [vmem:[#allocation8 + $0x68] sm:$0xff]  ;;  %v1128_v29 = vld [vmem:[#allocation8 + $0x180] sm:$0xff] }
 0x10c   :  { %1069 = vmatprep.mubr.f32.mxu0 %v1533_v17  ;;  %999 = vmatmul.mubr.f32.vlgmr.msra.gmra.mxu1 %v1590_v12  ;;  %v1108_v17 = vld [vmem:[#allocation8 + $0xe0] sm:$0xff]  ;;  %v1113_v28 = vld [vmem:[#allocation8 + $0x108] sm:$0xff] }
 0x10d   :  { %1310 = vmatmul.mubr.msk.f32.vlgmr.msra.gmra.mxu0 %vm504_vm0, %v1395_v32  ;;  %1312 = vmatprep.subr.mxu0 %v1111_v30  ;;  %v1092_v12 = vld [vmem:[#allocation8 + $0x60] sm:$0xff] }
 0x10e   :  { %1313 = vmatpush3.msra.mxu0 %v1095_v31  ;;  %1347 = vmatprep.subr.mxu1 %v1143_v2  ;;  %v1112_v30 = vld [vmem:[#allocation8 + $0x100] sm:$0xff]  ;;  %v484_v31 = vlaneseq }
 0x10f   :  { %1314 = vmatprep.subr.mxu0 %v1110_v33  ;;  %1348 = vmatpush3.msra.mxu1 %v1127_v35 }
 0x110   :  { %1315 = vmatpush3.msra.mxu0 %v1094_v63  ;;  %1349 = vmatprep.subr.mxu1 %v1142_v36  ;;  %v485_v32 = vshrl.u32 %v484_v31, 7  ;;  %v482_v63 = vld [vmem:[#allocation7] sm:$0xf] }
 0x111   :  { %1316 = vmatprep.subr.mxu0 %v1109_v34  ;;  %1350 = vmatpush3.msra.mxu1 %v1126_v37 }
 0x112   :  { %1317 = vmatpush3.msra.mxu0 %v1093_v10  ;;  %1351 = vmatprep.subr.mxu1 %v1141_v38  ;;  %v486_v33 = vsub.s32 0, %v485_v32  ;;  %v490_v34 = vsub.s32 1, %v485_v32 }
 0x113   :  { %1318 = vmatprep.subr.mxu0 %v1108_v17  ;;  %1352 = vmatpush3.msra.mxu1 %v1125_v39 }
 0x114   :  { %1319 = vmatpush3.msra.mxu0 %v1092_v12  ;;  %1353 = vmatprep.subr.mxu1 %v1140_v41  ;;  %v487_v35 = vrot.slane %v482_v63, %v486_v33  ;;  %v491_v10 = vrot.slane %v482_v63, %v490_v34 }
 0x115   :  { %1320 = vmatprep.subr.mxu0 %v1107_v40  ;;  %1354 = vmatpush3.msra.mxu1 %v1124_v43 }
 0x116   :  { %1321 = vmatpush3.msra.mxu0 %v1091_v42  ;;  %1355 = vmatprep.subr.mxu1 %v1139_v45 }
 0x117   :  { %1322 = vmatprep.subr.mxu0 %v1106_v44  ;;  %1356 = vmatpush3.msra.mxu1 %v1123_v47 }
 0x118   :  { %1323 = vmatpush3.msra.mxu0 %v1090_v46  ;;  %1357 = vmatprep.subr.mxu1 %v1138_v49 }
 0x119   :  { %1324 = vmatprep.subr.mxu0 %v1105_v48  ;;  %1358 = vmatpush3.msra.mxu1 %v1122_v51  ;;  %v494_v51 = vsub.s32 2, %v485_v32 }
 0x11a   :  { %1325 = vmatpush3.msra.mxu0 %v1089_v50  ;;  %1359 = vmatprep.subr.mxu1 %v1137_v53 }
 0x11b   :  { %1326 = vmatprep.subr.mxu0 %v1104_v52  ;;  %1360 = vmatpush3.msra.mxu1 %v1121_v55  ;;  %v498_v52 = vsub.s32 3, %v485_v32 }
 0x11c   :  { %1327 = vmatpush3.msra.mxu0 %v1088_v54  ;;  %1361 = vmatprep.subr.mxu1 %v1136_v57  ;;  %v495_v54 = vrot.slane %v482_v63, %v494_v51 }
 0x11d   :  { %1328 = vmatprep.subr.mxu0 %v1103_v56  ;;  %1362 = vmatpush3.msra.mxu1 %v1120_v59  ;;  %v499_v56 = vrot.slane %v482_v63, %v498_v52 }
 0x11e   :  { %1329 = vmatpush3.msra.mxu0 %v1087_v58  ;;  %1363 = vmatprep.subr.mxu1 %v1135_v61 }
 0x11f   :  { %1330 = vmatprep.subr.mxu0 %v1102_v60  ;;  %1364 = vmatpush3.msra.mxu1 %v1119_v0 }
 0x120   :  { %1331 = vmatpush3.msra.mxu0 %v1086_v62  ;;  %1365 = vmatprep.subr.mxu1 %v1134_v16  ;;  %v1311_v16 = vld [vmem:[#allocation10] ss:$0 sm:$0xff] }
 0x121   :  { %1332 = vmatprep.subr.mxu0 %v1101_v1  ;;  %1366 = vmatpush3.msra.mxu1 %v1118_v18 }
 0x122   :  { %1333 = vmatpush3.msra.mxu0 %v1085_v3  ;;  %1367 = vmatprep.subr.mxu1 %v1133_v19 }
 0x123   :  { %1334 = vmatprep.subr.mxu0 %v1100_v4  ;;  %1368 = vmatpush3.msra.mxu1 %v1117_v20 }
 0x124   :  { %1335 = vmatpush3.msra.mxu0 %v1084_v5  ;;  %1369 = vmatprep.subr.mxu1 %v1132_v21 }
 0x125   :  { %1336 = vmatprep.subr.mxu0 %v1099_v6  ;;  %1370 = vmatpush3.msra.mxu1 %v1116_v22 }
 0x126   :  { %1337 = vmatpush3.msra.mxu0 %v1083_v7  ;;  %1371 = vmatprep.subr.mxu1 %v1131_v23 }
 0x127   :  { %1338 = vmatprep.subr.mxu0 %v1098_v8  ;;  %1372 = vmatpush3.msra.mxu1 %v1115_v24 }
 0x128   :  { %1339 = vmatpush3.msra.mxu0 %v1082_v9  ;;  %1373 = vmatprep.subr.mxu1 %v1130_v25 }
 0x129   :  { %1340 = vmatprep.subr.mxu0 %v1097_v11  ;;  %1374 = vmatpush3.msra.mxu1 %v1114_v26 }
 0x12a   :  { %1341 = vmatpush3.msra.mxu0 %v1081_v13  ;;  %1375 = vmatprep.subr.mxu1 %v1129_v27 }
 0x12b   :  { %1342 = vmatprep.subr.mxu0 %v1096_v14  ;;  %1376 = vmatpush3.msra.mxu1 %v1113_v28 }
 0x12c   :  { %1343 = vmatpush3.msra.mxu0 %v1080_v15  ;;  %1377 = vmatprep.subr.mxu1 %v1128_v29 }
 0x12d   :  { %1378 = vmatpush3.msra.mxu1 %v1112_v30 }
 0x142   :  { %v574_v2 = vpop.f32.mrf.mxu0 }
 0x143   :  { %v645_v36 = vpop.f32.mrf.mxu1  ;;  %v575_v17 = vadd.f32 %v574_v2, %v487_v35 }
 0x144   :  { %v576_v37 = vpop.f32.mrf.mxu0 }
 0x145   :  { %v647_v38 = vpop.f32.mrf.mxu1  ;;  %v577_v12 = vadd.f32 %v576_v37, %v491_v10  ;;  %v646_v39 = vadd.f32 %v645_v36, %v575_v17 }
 0x147   :  { %v648_v42 = vadd.f32 %v647_v38, %v577_v12 }
 0x148   :  { %v787_v40 = vpop.f32.mrf.mxu1 }
 0x14a   :  { %v789_v46 = vpop.f32.mrf.mxu1 }
 0x185   :  { %v716_v41 = vpop.f32.mrf.mxu0 }
 0x186   :  { %v717_v43 = vadd.f32 %v716_v41, %v646_v39 }
 0x187   :  { %v718_v44 = vpop.f32.mrf.mxu0 }
 0x188   :  { %v719_v45 = vadd.f32 %v718_v44, %v648_v42  ;;  %v788_v47 = vadd.f32 %v787_v40, %v717_v43 }
 0x18a   :  { %v790_v48 = vadd.f32 %v789_v46, %v719_v45  ;;  %v1076_v50 = vmax.f32 %v788_v47, 0.0  ;;  %v858_v53 = vpop.f32.mrf.mxu1 }
 0x18b   :  { %v859_v59 = vadd.f32 %v858_v53, %v495_v54 }
 0x18c   :  { %v1077_v49 = vmax.f32 %v790_v48, 0.0  ;;  %v860_v57 = vpop.f32.mrf.mxu1 }
 0x18d   :  { %v861_v60 = vadd.f32 %v860_v57, %v499_v56 }
 0x18e   :  { %1215 = vmatprep.mubr.f32.mxu0 %v1077_v49 }
 0x18f   :  { %1216 = vmatmul.mubr.f32.vlgmr.msra.gmra.mxu0 %v1076_v50 }
 0x1c7   :  { %v929_v55 = vpop.f32.mrf.mxu0 }
 0x1c8   :  { %v930_v61 = vadd.f32 %v929_v55, %v859_v59 }
 0x1c9   :  { %v931_v58 = vpop.f32.mrf.mxu0 }
 0x1ca   :  { %v932_v1 = vadd.f32 %v931_v58, %v861_v60 }
 0x1cc   :  { %v1000_v62 = vpop.f32.mrf.mxu1 }
 0x1cd   :  { %v1071_v0 = vpop.f32.mrf.mxu0  ;;  %v1001_v3 = vadd.f32 %v1000_v62, %v930_v61 }
 0x1ce   :  { %v1002_v4 = vpop.f32.mrf.mxu1 }
 0x1cf   :  { %v1003_v5 = vadd.f32 %v1002_v4, %v932_v1  ;;  %v1072_v6 = vadd.f32 %v1071_v0, %v1001_v3  ;;  %v1073_v7 = vpop.f32.mrf.mxu0 }
 0x1d1   :  { %v1074_v8 = vadd.f32 %v1073_v7, %v1003_v5  ;;  %v1078_v11 = vmax.f32 %v1072_v6, 0.0 }
 0x1d3   :  { %v1079_v9 = vmax.f32 %v1074_v8, 0.0 }
 0x1d5   :  { %1285 = vmatprep.mubr.f32.mxu1 %v1079_v9 }
 0x1d6   :  { %1286 = vmatmul.mubr.f32.vlgmr.msra.gmra.mxu1 %v1078_v11 }
 0x24f   :  { %v1344_v13 = vpop.f32.mrf.mxu0 }
 0x251   :  { %v1345_v14 = vpop.f32.mrf.mxu0 }
 0x252   :  { %v1346_v15 = vadd.f32 %v1345_v14, %v1344_v13 }
 0x254   :  { %v1218_v20 = vadd.f32 %v1346_v15, %v1311_v16 }
 0x296   :  { %v1379_v18 = vpop.f32.mrf.mxu1 }
 0x298   :  { %v1380_v19 = vpop.f32.mrf.mxu1 }
 0x299   :  { %v1381_v21 = vadd.f32 %v1380_v19, %v1379_v18 }
 0x29b   :  { %v1288_v22 = vadd.f32 %v1381_v21, %v1218_v20 }
 0x29d   :  { %1291 = vst [vmem:[#allocation11] sm:$0xff] %v1288_v22 }
 0x29e   :  { %1507 = shalt.err (!%p1504_p1)
}
 0x29f   :  { %1301 = dma.vmem_to_hbm [thread:$0]  %s1299_s4, 128, %s1608_s5, [#allocation4]  }
 0x2a0   :  { %1522 = dma.done.wait [#allocation4], 128  }
 0x2a1   :  { %1523 = vsyncadd [#allocation4], 4294967168 }
 0x2a2   :  { %1305 = vsyncpa [#allocation3], 1 }
 0x2a3   :  { %1306 = vsyncpa [#allocation6], 1 }
 0x2a4   :  { %1307 = vsyncpa [#allocation9], 1 }
 0x2a5   :  { %1308 = vsyncpa [#allocation4], 1 }

</bundles_post_ra>
